<compile_context>
chip_gen: v5e
topology: v5e:2x2
jax: 0.10.0
libtpu: 0.0.40
codegen_flags: <defaults>
</compile_context>

<pallas_src>
import functools

import jax
import jax.numpy as jnp
from jax.experimental import pallas as pl
from jax.experimental.pallas import tpu as pltpu


NUM_FEATURES = 5
HIDDEN_SIZE = 30
NUM_LAYERS = 1          # module default; kernel implements the single-layer case
HIDDEN_PAD = 128        # one full lane block per gate
SUBLANE = 8             # batch padded to a multiple of this


def _lstm_kernel(x_ref, w_ih_ref, w_hh_ref, b_ref, w_fc_ref, b_fc_ref, out_ref,
                 *, seq_len, batch, batch_pad):
    """Whole-sequence LSTM + final Linear(H, 1) in one kernel invocation.

    x_ref    : (T*Bp, F)     f32 VMEM  (time-major, batch padded to Bp=8k)
    w_ih_ref : (F, 4*Hp)     f32 VMEM  (gate order i,f,o,g; each gate 128 lanes;
                                        g-gate columns pre-scaled by 2)
    w_hh_ref : (Hp, 4*Hp)    f32 VMEM  (same packing; input dim padded to Hp)
    b_ref    : (1, 4*Hp)     f32 VMEM  (b_ih + b_hh, same packing / scaling)
    w_fc_ref : (1, Hp)       f32 VMEM  (final linear row, lane-padded with zeros)
    b_fc_ref : (1, 1)        f32 VMEM
    out_ref  : (B, 1)        f32 VMEM
    """
    Hp = w_hh_ref.shape[0]
    Bp = batch_pad

    # Hoisted input projection + bias: single MXU matmul off the serial path.
    x_proj = (
        jnp.dot(x_ref[...], w_ih_ref[...], preferred_element_type=jnp.float32)
        + b_ref[...]
    )  # (T*Bp, 4*Hp)

    w_hh = w_hh_ref[...]  # (Hp, 4*Hp), loaded once
    # TODO(synk): hold W_hh resident via pltpu.matmul_push_rhs/acc_lhs/pop to
    # drop the per-step RHS weight push; and/or feed the MXU bf16 inputs with
    # f32 accumulation (needs a looser tolerance than the f32 reference).

    h = jnp.zeros((Bp, Hp), jnp.float32)
    c = jnp.zeros((Bp, Hp), jnp.float32)

    # Fully-unrolled serial recurrence (T is static and small).
    # TODO(synk): for large T switch to lax.fori_loop(..., unroll=k).
    for t in range(seq_len):
        # 8-aligned sublane slice (Bp is a multiple of 8, t is static).
        gates = x_proj[t * Bp:(t + 1) * Bp, :] + jnp.dot(
            h, w_hh, preferred_element_type=jnp.float32)       # (Bp, 4*Hp)
        # Single EUP sigmoid over all four gate blocks; whole-vreg lane slices.
        sig = jax.nn.sigmoid(gates)
        i_g = sig[:, 0 * Hp:1 * Hp]
        f_g = sig[:, 1 * Hp:2 * Hp]
        o_g = sig[:, 2 * Hp:3 * Hp]
        g_g = 2.0 * sig[:, 3 * Hp:4 * Hp] - 1.0   # tanh(z) == 2*sigmoid(2z) - 1
        c = f_g * c + i_g * g_g
        h = o_g * jnp.tanh(c)                      # second (and last) EUP push

    # Tail FC: VPU multiply + lane reduce instead of a 1-lane MXU matmul.
    fc = jnp.sum(h * w_fc_ref[...], axis=-1, keepdims=True) + b_fc_ref[...]  # (Bp, 1)
    out_ref[...] = fc[:batch, :]


def pack_params(params, hidden_pad=HIDDEN_PAD):
    """One-time weight prep: reorder gates (i,f,g,o)->(i,f,o,g), pad each gate to
    `hidden_pad` lanes, pre-scale the g-gate by 2 (tanh-via-sigmoid), transpose,
    and fold the two biases. Call once and reuse across lstm_forward calls."""
    w_ih, w_hh = params["w_ih"], params["w_hh"]
    bias = params["b_ih"] + params["b_hh"]
    H = w_hh.shape[1]
    Hp = hidden_pad

    def split_gates(w):  # PyTorch row order: i, f, g, o
        return (w[0:H], w[H:2 * H], w[2 * H:3 * H], w[3 * H:4 * H])

    def pack_w(w):       # (4H, D) -> (D, 4*Hp) in order i, f, o, g (g scaled by 2)
        gi, gf, gg, go = split_gates(w)
        blk = lambda a, s=1.0: jnp.pad(a.T * s, ((0, 0), (0, Hp - H)))
        return jnp.concatenate([blk(gi), blk(gf), blk(go), blk(gg, 2.0)], axis=1)

    def pack_b(bv):      # (4H,) -> (1, 4*Hp)
        gi, gf, gg, go = split_gates(bv)
        blk = lambda a, s=1.0: jnp.pad(a * s, (0, Hp - H))
        return jnp.concatenate([blk(gi), blk(gf), blk(go), blk(gg, 2.0)]).reshape(1, 4 * Hp)

    w_ih_p = pack_w(w_ih)                                   # (F, 4*Hp)
    w_hh_p = jnp.pad(pack_w(w_hh), ((0, Hp - H), (0, 0)))   # (Hp, 4*Hp)
    return {
        "w_ih": w_ih_p,
        "w_hh": w_hh_p,
        "b": pack_b(bias),                                  # (1, 4*Hp)
        "w_fc": jnp.pad(params["w_fc"], ((0, 0), (0, Hp - H))),  # (1, Hp)
        "b_fc": params["b_fc"].reshape(1, 1),               # (1, 1)
    }


@jax.jit
def lstm_forward(x, packed):
    """x: (B, T, F) float32, packed: output of pack_params. Returns (B, 1) f32."""
    B, T, F = x.shape
    Bp = ((B + SUBLANE - 1) // SUBLANE) * SUBLANE

    # Per-call glue limited to the x layout: time-major + sublane-pad the batch
    # so every per-step slice inside the kernel is 8-sublane aligned.
    x_tm = jnp.transpose(x, (1, 0, 2))                      # (T, B, F)
    x_pad = jnp.pad(x_tm, ((0, 0), (0, Bp - B), (0, 0)))    # (T, Bp, F)
    x_flat = x_pad.reshape(T * Bp, F)                       # (T*Bp, F)

    vmem = pl.BlockSpec(memory_space=pltpu.MemorySpace.VMEM)
    kernel = functools.partial(_lstm_kernel, seq_len=T, batch=B, batch_pad=Bp)
    return pl.pallas_call(
        kernel,
        out_shape=jax.ShapeDtypeStruct((B, 1), jnp.float32),
        in_specs=[vmem] * 6,
        out_specs=vmem,
    )(x_flat, packed["w_ih"], packed["w_hh"], packed["b"],
      packed["w_fc"], packed["b_fc"])
    # TODO(synk): for much larger B, add a batch grid axis with
    # dimension_semantics=("parallel",) so v7x's two TensorCores each run an
    # independent batch shard; for large T, pipeline the time axis (the resident
    # x_proj hits v7x's 64 MiB VMEM at ~half the T*B of v5e/v6e).


def init_params(key, num_features=NUM_FEATURES, hidden_size=HIDDEN_SIZE):
    """Deterministic synthetic parameters (PyTorch-style uniform init)."""
    k = 1.0 / jnp.sqrt(hidden_size)
    keys = jax.random.split(key, 6)
    u = lambda kk, shape, bound: jax.random.uniform(
        kk, shape, jnp.float32, minval=-bound, maxval=bound)
    return {
        "w_ih": u(keys[0], (4 * hidden_size, num_features), k),
        "w_hh": u(keys[1], (4 * hidden_size, hidden_size), k),
        "b_ih": u(keys[2], (4 * hidden_size,), k),
        "b_hh": u(keys[3], (4 * hidden_size,), k),
        "w_fc": u(keys[4], (1, hidden_size), 1.0 / jnp.sqrt(hidden_size)),
        "b_fc": u(keys[5], (1,), 1.0 / jnp.sqrt(hidden_size)),
    }


def lstm_forward_ref(x, params):
    """Pure-JAX reference implementation (PyTorch gate order, for verification)."""
    B, T, F = x.shape
    H = params["w_hh"].shape[1]
    w_ih_t = params["w_ih"].T
    w_hh_t = params["w_hh"].T
    b = params["b_ih"] + params["b_hh"]

    def step(carry, x_t):
        h, c = carry
        gates = x_t @ w_ih_t + h @ w_hh_t + b
        i_g = jax.nn.sigmoid(gates[:, 0 * H:1 * H])
        f_g = jax.nn.sigmoid(gates[:, 1 * H:2 * H])
        g_g = jnp.tanh(gates[:, 2 * H:3 * H])
        o_g = jax.nn.sigmoid(gates[:, 3 * H:4 * H])
        c = f_g * c + i_g * g_g
        h = o_g * jnp.tanh(c)
        return (h, c), None

    h0 = jnp.zeros((B, H), jnp.float32)
    c0 = jnp.zeros((B, H), jnp.float32)
    (h_last, _), _ = jax.lax.scan(step, (h0, c0), jnp.transpose(x, (1, 0, 2)))
    return h_last @ params["w_fc"].T + params["b_fc"]


if __name__ == "__main__":
    B, T, F = 2, 8, NUM_FEATURES
    key = jax.random.PRNGKey(0)
    kx, kp = jax.random.split(key)
    x = jax.random.normal(kx, (B, T, F), dtype=jnp.float32)
    params = init_params(kp)

    # One-time weight packing (off the per-inference latency path).
    packed = pack_params(params)

    out = lstm_forward(x, packed)
    out = jax.block_until_ready(out)

    ref = lstm_forward_ref(x, params)
    assert out.shape == (B, 1), out.shape
    assert jnp.allclose(out, ref, atol=1e-4, rtol=1e-4), (out, ref)

    print("KERNEL_OK")
</pallas_src>

<mosaic_0001>
module attributes {stable_mosaic.version = 11 : i64} {
  func.func @_lstm_kernel(%arg0: memref<64x5xf32, #tpu.memory_space<vmem>>, %arg1: memref<5x512xf32, #tpu.memory_space<vmem>>, %arg2: memref<128x512xf32, #tpu.memory_space<vmem>>, %arg3: memref<1x512xf32, #tpu.memory_space<vmem>>, %arg4: memref<1x128xf32, #tpu.memory_space<vmem>>, %arg5: memref<1x1xf32, #tpu.memory_space<vmem>>, %arg6: memref<2x1xf32, #tpu.memory_space<vmem>>) attributes {dimension_semantics = [], scalar_prefetch = 0 : i64, scratch_operands = 0 : i64, tpu.core_type = #tpu.core_type<tc>} {
    %c0 = arith.constant 0 : index
    %c0_0 = arith.constant 0 : index
    %0 = vector.load %arg0[%c0, %c0_0] : memref<64x5xf32, #tpu.memory_space<vmem>>, vector<64x5xf32>
    %c0_1 = arith.constant 0 : index
    %c0_2 = arith.constant 0 : index
    %1 = vector.load %arg1[%c0_1, %c0_2] : memref<5x512xf32, #tpu.memory_space<vmem>>, vector<5x512xf32>
    %cst = arith.constant dense<0.000000e+00> : vector<64x512xf32>
    %2 = tpu.matmul %0, %1, %cst {dimension_numbers = #tpu.dot_dimension_numbers<[1], [0], [0], [1], [0, 0, 1, 1], [], []>} : vector<64x5xf32>, vector<5x512xf32>, vector<64x512xf32> -> vector<64x512xf32>
    %c0_3 = arith.constant 0 : index
    %c0_4 = arith.constant 0 : index
    %3 = vector.load %arg3[%c0_3, %c0_4] : memref<1x512xf32, #tpu.memory_space<vmem>>, vector<1x512xf32>
    %4 = vector.broadcast %3 : vector<1x512xf32> to vector<64x512xf32>
    %5 = arith.addf %2, %4 : vector<64x512xf32>
    %c0_5 = arith.constant 0 : index
    %c0_6 = arith.constant 0 : index
    %6 = vector.load %arg2[%c0_5, %c0_6] : memref<128x512xf32, #tpu.memory_space<vmem>>, vector<128x512xf32>
    %cst_7 = arith.constant 0.000000e+00 : f32
    %7 = vector.broadcast %cst_7 : f32 to vector<8x128xf32>
    %cst_8 = arith.constant 0.000000e+00 : f32
    %8 = vector.broadcast %cst_8 : f32 to vector<8x128xf32>
    %9 = vector.extract_strided_slice %5 {offsets = [0, 0], sizes = [8, 512], strides = [1, 1]} : vector<64x512xf32> to vector<8x512xf32>
    %cst_9 = arith.constant dense<0.000000e+00> : vector<8x512xf32>
    %10 = tpu.matmul %7, %6, %cst_9 {dimension_numbers = #tpu.dot_dimension_numbers<[1], [0], [0], [1], [0, 0, 1, 1], [], []>} : vector<8x128xf32>, vector<128x512xf32>, vector<8x512xf32> -> vector<8x512xf32>
    %11 = arith.addf %9, %10 : vector<8x512xf32>
    %12 = arith.negf %11 : vector<8x512xf32>
    %13 = math.exp %12 : vector<8x512xf32>
    %cst_10 = arith.constant 1.000000e+00 : f32
    %14 = vector.broadcast %cst_10 : f32 to vector<8x512xf32>
    %15 = arith.addf %14, %13 : vector<8x512xf32>
    %16 = arith.divf %14, %15 : vector<8x512xf32>
    %17 = vector.extract_strided_slice %16 {offsets = [0, 0], sizes = [8, 128], strides = [1, 1]} : vector<8x512xf32> to vector<8x128xf32>
    %18 = vector.extract_strided_slice %16 {offsets = [0, 128], sizes = [8, 128], strides = [1, 1]} : vector<8x512xf32> to vector<8x128xf32>
    %19 = vector.extract_strided_slice %16 {offsets = [0, 256], sizes = [8, 128], strides = [1, 1]} : vector<8x512xf32> to vector<8x128xf32>
    %20 = vector.extract_strided_slice %16 {offsets = [0, 384], sizes = [8, 128], strides = [1, 1]} : vector<8x512xf32> to vector<8x128xf32>
    %cst_11 = arith.constant 2.000000e+00 : f32
    %21 = vector.broadcast %cst_11 : f32 to vector<8x128xf32>
    %22 = arith.mulf %21, %20 : vector<8x128xf32>
    %cst_12 = arith.constant 1.000000e+00 : f32
    %23 = vector.broadcast %cst_12 : f32 to vector<8x128xf32>
    %24 = arith.subf %22, %23 : vector<8x128xf32>
    %25 = arith.mulf %18, %8 : vector<8x128xf32>
    %26 = arith.mulf %17, %24 : vector<8x128xf32>
    %27 = arith.addf %25, %26 : vector<8x128xf32>
    %28 = math.tanh %27 : vector<8x128xf32>
    %29 = arith.mulf %19, %28 : vector<8x128xf32>
    %30 = vector.extract_strided_slice %5 {offsets = [8, 0], sizes = [8, 512], strides = [1, 1]} : vector<64x512xf32> to vector<8x512xf32>
    %cst_13 = arith.constant dense<0.000000e+00> : vector<8x512xf32>
    %31 = tpu.matmul %29, %6, %cst_13 {dimension_numbers = #tpu.dot_dimension_numbers<[1], [0], [0], [1], [0, 0, 1, 1], [], []>} : vector<8x128xf32>, vector<128x512xf32>, vector<8x512xf32> -> vector<8x512xf32>
    %32 = arith.addf %30, %31 : vector<8x512xf32>
    %33 = arith.negf %32 : vector<8x512xf32>
    %34 = math.exp %33 : vector<8x512xf32>
    %cst_14 = arith.constant 1.000000e+00 : f32
    %35 = vector.broadcast %cst_14 : f32 to vector<8x512xf32>
    %36 = arith.addf %35, %34 : vector<8x512xf32>
    %37 = arith.divf %35, %36 : vector<8x512xf32>
    %38 = vector.extract_strided_slice %37 {offsets = [0, 0], sizes = [8, 128], strides = [1, 1]} : vector<8x512xf32> to vector<8x128xf32>
    %39 = vector.extract_strided_slice %37 {offsets = [0, 128], sizes = [8, 128], strides = [1, 1]} : vector<8x512xf32> to vector<8x128xf32>
    %40 = vector.extract_strided_slice %37 {offsets = [0, 256], sizes = [8, 128], strides = [1, 1]} : vector<8x512xf32> to vector<8x128xf32>
    %41 = vector.extract_strided_slice %37 {offsets = [0, 384], sizes = [8, 128], strides = [1, 1]} : vector<8x512xf32> to vector<8x128xf32>
    %cst_15 = arith.constant 2.000000e+00 : f32
    %42 = vector.broadcast %cst_15 : f32 to vector<8x128xf32>
    %43 = arith.mulf %42, %41 : vector<8x128xf32>
    %cst_16 = arith.constant 1.000000e+00 : f32
    %44 = vector.broadcast %cst_16 : f32 to vector<8x128xf32>
    %45 = arith.subf %43, %44 : vector<8x128xf32>
    %46 = arith.mulf %39, %27 : vector<8x128xf32>
    %47 = arith.mulf %38, %45 : vector<8x128xf32>
    %48 = arith.addf %46, %47 : vector<8x128xf32>
    %49 = math.tanh %48 : vector<8x128xf32>
    %50 = arith.mulf %40, %49 : vector<8x128xf32>
    %51 = vector.extract_strided_slice %5 {offsets = [16, 0], sizes = [8, 512], strides = [1, 1]} : vector<64x512xf32> to vector<8x512xf32>
    %cst_17 = arith.constant dense<0.000000e+00> : vector<8x512xf32>
    %52 = tpu.matmul %50, %6, %cst_17 {dimension_numbers = #tpu.dot_dimension_numbers<[1], [0], [0], [1], [0, 0, 1, 1], [], []>} : vector<8x128xf32>, vector<128x512xf32>, vector<8x512xf32> -> vector<8x512xf32>
    %53 = arith.addf %51, %52 : vector<8x512xf32>
    %54 = arith.negf %53 : vector<8x512xf32>
    %55 = math.exp %54 : vector<8x512xf32>
    %cst_18 = arith.constant 1.000000e+00 : f32
    %56 = vector.broadcast %cst_18 : f32 to vector<8x512xf32>
    %57 = arith.addf %56, %55 : vector<8x512xf32>
    %58 = arith.divf %56, %57 : vector<8x512xf32>
    %59 = vector.extract_strided_slice %58 {offsets = [0, 0], sizes = [8, 128], strides = [1, 1]} : vector<8x512xf32> to vector<8x128xf32>
    %60 = vector.extract_strided_slice %58 {offsets = [0, 128], sizes = [8, 128], strides = [1, 1]} : vector<8x512xf32> to vector<8x128xf32>
    %61 = vector.extract_strided_slice %58 {offsets = [0, 256], sizes = [8, 128], strides = [1, 1]} : vector<8x512xf32> to vector<8x128xf32>
    %62 = vector.extract_strided_slice %58 {offsets = [0, 384], sizes = [8, 128], strides = [1, 1]} : vector<8x512xf32> to vector<8x128xf32>
    %cst_19 = arith.constant 2.000000e+00 : f32
    %63 = vector.broadcast %cst_19 : f32 to vector<8x128xf32>
    %64 = arith.mulf %63, %62 : vector<8x128xf32>
    %cst_20 = arith.constant 1.000000e+00 : f32
    %65 = vector.broadcast %cst_20 : f32 to vector<8x128xf32>
    %66 = arith.subf %64, %65 : vector<8x128xf32>
    %67 = arith.mulf %60, %48 : vector<8x128xf32>
    %68 = arith.mulf %59, %66 : vector<8x128xf32>
    %69 = arith.addf %67, %68 : vector<8x128xf32>
    %70 = math.tanh %69 : vector<8x128xf32>
    %71 = arith.mulf %61, %70 : vector<8x128xf32>
    %72 = vector.extract_strided_slice %5 {offsets = [24, 0], sizes = [8, 512], strides = [1, 1]} : vector<64x512xf32> to vector<8x512xf32>
    %cst_21 = arith.constant dense<0.000000e+00> : vector<8x512xf32>
    %73 = tpu.matmul %71, %6, %cst_21 {dimension_numbers = #tpu.dot_dimension_numbers<[1], [0], [0], [1], [0, 0, 1, 1], [], []>} : vector<8x128xf32>, vector<128x512xf32>, vector<8x512xf32> -> vector<8x512xf32>
    %74 = arith.addf %72, %73 : vector<8x512xf32>
    %75 = arith.negf %74 : vector<8x512xf32>
    %76 = math.exp %75 : vector<8x512xf32>
    %cst_22 = arith.constant 1.000000e+00 : f32
    %77 = vector.broadcast %cst_22 : f32 to vector<8x512xf32>
    %78 = arith.addf %77, %76 : vector<8x512xf32>
    %79 = arith.divf %77, %78 : vector<8x512xf32>
    %80 = vector.extract_strided_slice %79 {offsets = [0, 0], sizes = [8, 128], strides = [1, 1]} : vector<8x512xf32> to vector<8x128xf32>
    %81 = vector.extract_strided_slice %79 {offsets = [0, 128], sizes = [8, 128], strides = [1, 1]} : vector<8x512xf32> to vector<8x128xf32>
    %82 = vector.extract_strided_slice %79 {offsets = [0, 256], sizes = [8, 128], strides = [1, 1]} : vector<8x512xf32> to vector<8x128xf32>
    %83 = vector.extract_strided_slice %79 {offsets = [0, 384], sizes = [8, 128], strides = [1, 1]} : vector<8x512xf32> to vector<8x128xf32>
    %cst_23 = arith.constant 2.000000e+00 : f32
    %84 = vector.broadcast %cst_23 : f32 to vector<8x128xf32>
    %85 = arith.mulf %84, %83 : vector<8x128xf32>
    %cst_24 = arith.constant 1.000000e+00 : f32
    %86 = vector.broadcast %cst_24 : f32 to vector<8x128xf32>
    %87 = arith.subf %85, %86 : vector<8x128xf32>
    %88 = arith.mulf %81, %69 : vector<8x128xf32>
    %89 = arith.mulf %80, %87 : vector<8x128xf32>
    %90 = arith.addf %88, %89 : vector<8x128xf32>
    %91 = math.tanh %90 : vector<8x128xf32>
    %92 = arith.mulf %82, %91 : vector<8x128xf32>
    %93 = vector.extract_strided_slice %5 {offsets = [32, 0], sizes = [8, 512], strides = [1, 1]} : vector<64x512xf32> to vector<8x512xf32>
    %cst_25 = arith.constant dense<0.000000e+00> : vector<8x512xf32>
    %94 = tpu.matmul %92, %6, %cst_25 {dimension_numbers = #tpu.dot_dimension_numbers<[1], [0], [0], [1], [0, 0, 1, 1], [], []>} : vector<8x128xf32>, vector<128x512xf32>, vector<8x512xf32> -> vector<8x512xf32>
    %95 = arith.addf %93, %94 : vector<8x512xf32>
    %96 = arith.negf %95 : vector<8x512xf32>
    %97 = math.exp %96 : vector<8x512xf32>
    %cst_26 = arith.constant 1.000000e+00 : f32
    %98 = vector.broadcast %cst_26 : f32 to vector<8x512xf32>
    %99 = arith.addf %98, %97 : vector<8x512xf32>
    %100 = arith.divf %98, %99 : vector<8x512xf32>
    %101 = vector.extract_strided_slice %100 {offsets = [0, 0], sizes = [8, 128], strides = [1, 1]} : vector<8x512xf32> to vector<8x128xf32>
    %102 = vector.extract_strided_slice %100 {offsets = [0, 128], sizes = [8, 128], strides = [1, 1]} : vector<8x512xf32> to vector<8x128xf32>
    %103 = vector.extract_strided_slice %100 {offsets = [0, 256], sizes = [8, 128], strides = [1, 1]} : vector<8x512xf32> to vector<8x128xf32>
    %104 = vector.extract_strided_slice %100 {offsets = [0, 384], sizes = [8, 128], strides = [1, 1]} : vector<8x512xf32> to vector<8x128xf32>
    %cst_27 = arith.constant 2.000000e+00 : f32
    %105 = vector.broadcast %cst_27 : f32 to vector<8x128xf32>
    %106 = arith.mulf %105, %104 : vector<8x128xf32>
    %cst_28 = arith.constant 1.000000e+00 : f32
    %107 = vector.broadcast %cst_28 : f32 to vector<8x128xf32>
    %108 = arith.subf %106, %107 : vector<8x128xf32>
    %109 = arith.mulf %102, %90 : vector<8x128xf32>
    %110 = arith.mulf %101, %108 : vector<8x128xf32>
    %111 = arith.addf %109, %110 : vector<8x128xf32>
    %112 = math.tanh %111 : vector<8x128xf32>
    %113 = arith.mulf %103, %112 : vector<8x128xf32>
    %114 = vector.extract_strided_slice %5 {offsets = [40, 0], sizes = [8, 512], strides = [1, 1]} : vector<64x512xf32> to vector<8x512xf32>
    %cst_29 = arith.constant dense<0.000000e+00> : vector<8x512xf32>
    %115 = tpu.matmul %113, %6, %cst_29 {dimension_numbers = #tpu.dot_dimension_numbers<[1], [0], [0], [1], [0, 0, 1, 1], [], []>} : vector<8x128xf32>, vector<128x512xf32>, vector<8x512xf32> -> vector<8x512xf32>
    %116 = arith.addf %114, %115 : vector<8x512xf32>
    %117 = arith.negf %116 : vector<8x512xf32>
    %118 = math.exp %117 : vector<8x512xf32>
    %cst_30 = arith.constant 1.000000e+00 : f32
    %119 = vector.broadcast %cst_30 : f32 to vector<8x512xf32>
    %120 = arith.addf %119, %118 : vector<8x512xf32>
    %121 = arith.divf %119, %120 : vector<8x512xf32>
    %122 = vector.extract_strided_slice %121 {offsets = [0, 0], sizes = [8, 128], strides = [1, 1]} : vector<8x512xf32> to vector<8x128xf32>
    %123 = vector.extract_strided_slice %121 {offsets = [0, 128], sizes = [8, 128], strides = [1, 1]} : vector<8x512xf32> to vector<8x128xf32>
    %124 = vector.extract_strided_slice %121 {offsets = [0, 256], sizes = [8, 128], strides = [1, 1]} : vector<8x512xf32> to vector<8x128xf32>
    %125 = vector.extract_strided_slice %121 {offsets = [0, 384], sizes = [8, 128], strides = [1, 1]} : vector<8x512xf32> to vector<8x128xf32>
    %cst_31 = arith.constant 2.000000e+00 : f32
    %126 = vector.broadcast %cst_31 : f32 to vector<8x128xf32>
    %127 = arith.mulf %126, %125 : vector<8x128xf32>
    %cst_32 = arith.constant 1.000000e+00 : f32
    %128 = vector.broadcast %cst_32 : f32 to vector<8x128xf32>
    %129 = arith.subf %127, %128 : vector<8x128xf32>
    %130 = arith.mulf %123, %111 : vector<8x128xf32>
    %131 = arith.mulf %122, %129 : vector<8x128xf32>
    %132 = arith.addf %130, %131 : vector<8x128xf32>
    %133 = math.tanh %132 : vector<8x128xf32>
    %134 = arith.mulf %124, %133 : vector<8x128xf32>
    %135 = vector.extract_strided_slice %5 {offsets = [48, 0], sizes = [8, 512], strides = [1, 1]} : vector<64x512xf32> to vector<8x512xf32>
    %cst_33 = arith.constant dense<0.000000e+00> : vector<8x512xf32>
    %136 = tpu.matmul %134, %6, %cst_33 {dimension_numbers = #tpu.dot_dimension_numbers<[1], [0], [0], [1], [0, 0, 1, 1], [], []>} : vector<8x128xf32>, vector<128x512xf32>, vector<8x512xf32> -> vector<8x512xf32>
    %137 = arith.addf %135, %136 : vector<8x512xf32>
    %138 = arith.negf %137 : vector<8x512xf32>
    %139 = math.exp %138 : vector<8x512xf32>
    %cst_34 = arith.constant 1.000000e+00 : f32
    %140 = vector.broadcast %cst_34 : f32 to vector<8x512xf32>
    %141 = arith.addf %140, %139 : vector<8x512xf32>
    %142 = arith.divf %140, %141 : vector<8x512xf32>
    %143 = vector.extract_strided_slice %142 {offsets = [0, 0], sizes = [8, 128], strides = [1, 1]} : vector<8x512xf32> to vector<8x128xf32>
    %144 = vector.extract_strided_slice %142 {offsets = [0, 128], sizes = [8, 128], strides = [1, 1]} : vector<8x512xf32> to vector<8x128xf32>
    %145 = vector.extract_strided_slice %142 {offsets = [0, 256], sizes = [8, 128], strides = [1, 1]} : vector<8x512xf32> to vector<8x128xf32>
    %146 = vector.extract_strided_slice %142 {offsets = [0, 384], sizes = [8, 128], strides = [1, 1]} : vector<8x512xf32> to vector<8x128xf32>
    %cst_35 = arith.constant 2.000000e+00 : f32
    %147 = vector.broadcast %cst_35 : f32 to vector<8x128xf32>
    %148 = arith.mulf %147, %146 : vector<8x128xf32>
    %cst_36 = arith.constant 1.000000e+00 : f32
    %149 = vector.broadcast %cst_36 : f32 to vector<8x128xf32>
    %150 = arith.subf %148, %149 : vector<8x128xf32>
    %151 = arith.mulf %144, %132 : vector<8x128xf32>
    %152 = arith.mulf %143, %150 : vector<8x128xf32>
    %153 = arith.addf %151, %152 : vector<8x128xf32>
    %154 = math.tanh %153 : vector<8x128xf32>
    %155 = arith.mulf %145, %154 : vector<8x128xf32>
    %156 = vector.extract_strided_slice %5 {offsets = [56, 0], sizes = [8, 512], strides = [1, 1]} : vector<64x512xf32> to vector<8x512xf32>
    %cst_37 = arith.constant dense<0.000000e+00> : vector<8x512xf32>
    %157 = tpu.matmul %155, %6, %cst_37 {dimension_numbers = #tpu.dot_dimension_numbers<[1], [0], [0], [1], [0, 0, 1, 1], [], []>} : vector<8x128xf32>, vector<128x512xf32>, vector<8x512xf32> -> vector<8x512xf32>
    %158 = arith.addf %156, %157 : vector<8x512xf32>
    %159 = arith.negf %158 : vector<8x512xf32>
    %160 = math.exp %159 : vector<8x512xf32>
    %cst_38 = arith.constant 1.000000e+00 : f32
    %161 = vector.broadcast %cst_38 : f32 to vector<8x512xf32>
    %162 = arith.addf %161, %160 : vector<8x512xf32>
    %163 = arith.divf %161, %162 : vector<8x512xf32>
    %164 = vector.extract_strided_slice %163 {offsets = [0, 0], sizes = [8, 128], strides = [1, 1]} : vector<8x512xf32> to vector<8x128xf32>
    %165 = vector.extract_strided_slice %163 {offsets = [0, 128], sizes = [8, 128], strides = [1, 1]} : vector<8x512xf32> to vector<8x128xf32>
    %166 = vector.extract_strided_slice %163 {offsets = [0, 256], sizes = [8, 128], strides = [1, 1]} : vector<8x512xf32> to vector<8x128xf32>
    %167 = vector.extract_strided_slice %163 {offsets = [0, 384], sizes = [8, 128], strides = [1, 1]} : vector<8x512xf32> to vector<8x128xf32>
    %cst_39 = arith.constant 2.000000e+00 : f32
    %168 = vector.broadcast %cst_39 : f32 to vector<8x128xf32>
    %169 = arith.mulf %168, %167 : vector<8x128xf32>
    %cst_40 = arith.constant 1.000000e+00 : f32
    %170 = vector.broadcast %cst_40 : f32 to vector<8x128xf32>
    %171 = arith.subf %169, %170 : vector<8x128xf32>
    %172 = arith.mulf %165, %153 : vector<8x128xf32>
    %173 = arith.mulf %164, %171 : vector<8x128xf32>
    %174 = arith.addf %172, %173 : vector<8x128xf32>
    %175 = math.tanh %174 : vector<8x128xf32>
    %176 = arith.mulf %166, %175 : vector<8x128xf32>
    %c0_41 = arith.constant 0 : index
    %c0_42 = arith.constant 0 : index
    %177 = vector.load %arg4[%c0_41, %c0_42] : memref<1x128xf32, #tpu.memory_space<vmem>>, vector<1x128xf32>
    %178 = vector.broadcast %177 : vector<1x128xf32> to vector<8x128xf32>
    %179 = arith.mulf %176, %178 : vector<8x128xf32>
    %cst_43 = arith.constant dense<0.000000e+00> : vector<8xf32>
    %180 = vector.multi_reduction <add>, %179, %cst_43 [1] : vector<8x128xf32> to vector<8xf32>
    %181 = vector.shape_cast %180 : vector<8xf32> to vector<8x1xf32>
    %c0_44 = arith.constant 0 : index
    %c0_45 = arith.constant 0 : index
    %182 = vector.load %arg5[%c0_44, %c0_45] : memref<1x1xf32, #tpu.memory_space<vmem>>, vector<1x1xf32>
    %183 = vector.broadcast %182 : vector<1x1xf32> to vector<8x1xf32>
    %184 = arith.addf %181, %183 : vector<8x1xf32>
    %185 = vector.extract_strided_slice %184 {offsets = [0, 0], sizes = [2, 1], strides = [1, 1]} : vector<8x1xf32> to vector<2x1xf32>
    %c0_46 = arith.constant 0 : index
    %c0_47 = arith.constant 0 : index
    %186 = vector.load %arg6[%c0_46, %c0_47] : memref<2x1xf32, #tpu.memory_space<vmem>>, vector<2x1xf32>
    tpu.vector_store %arg6[%c0_46, %c0_47], %185 {strides = array<i32>} : memref<2x1xf32, #tpu.memory_space<vmem>>, vector<2x1xf32>,
    return
  }
}

</mosaic_0001>

<bundles_post_ra>
// kernel: lstm_forward.1
= control target key start
LH: loop header
LB: loop body
LE: loop exit
PB: predicated region body
PF: predicated region fallthrough
CT: control target
= control target key end

     0   :  { %s3076_s0 = inlined_call_operand.vmem [shape: f32[64,5], index: 0, kind: input, shape index: {}]   ;;  %s3077_s1 = inlined_call_operand.vmem [shape: f32[5,512], index: 1, kind: input, shape index: {}]   ;;  %s3078_s2 = inlined_call_operand.hbm [shape: f32[128,512], index: 2, kind: input, shape index: {}]   ;;  %s3079_s3 = inlined_call_operand.vmem [shape: f32[1,512], index: 3, kind: input, shape index: {}]   ;;  %s3080_s4 = inlined_call_operand.vmem [shape: f32[1,128], index: 4, kind: input, shape index: {}]   ;;  %s3081_s5 = inlined_call_operand.<no memory space> [shape: f32[1,1], index: 5, kind: input, shape index: {}]   ;;  %s3082_s6 = inlined_call_operand.vmem [shape: f32[2,1], index: 6, kind: output, shape index: {}]  }
   0x1   :  { %v11_v0 = vstv %s3081_s5 }
   0x2   :  { %12 = vst [vmem:[#allocation2] sm:$0x1] %v11_v0 }
   0x3   :  { %13 = vsyncpa [#allocation4], 0  ;;  %s22_s25 = sshll.u32 %s3078_s2, 4  ;;  %s2000_s26 = smov [#allocation3]   ;;  %s23_s25 = int_to_ptr.hbm [resolvable:$true] %s22_s25 }
   0x4   :  { %s24_s27 = sshll.u32 %s2000_s26, 4  ;;  %s2001_s28 = smov 512   ;;  %s25_s27 = int_to_ptr.vmem [resolvable:$true] %s24_s27 }
   0x5   :  { %s2002_s29 = smov 32  }
   0x6   :  { %30 = dma.hbm_to_vmem [thread:$0]  %s23_s25, 8192, %s25_s27, [#allocation4], %s2001_s28, %s2001_s28, %s2002_s29  }
   0x7   :  { %1998 = dma.done.wait [#allocation4], 8192  }
   0x8   :  { %1999 = vsyncadd [#allocation4], 4294959104  ;;  %vm88_vm0 = vcmask 1044480   ;;  %vm63_vm1 = vcmask 39936   ;;  %v49_v1 = vld [vmem:[%s3077_s1] sm:$0x1f] }
   0x9   :  { %v50_v2 = vld [vmem:[%s3077_s1 + $0x8] sm:$0x1f]  ;;  %v51_v3 = vld [vmem:[%s3077_s1 + $0x10] sm:$0x1f]  ;;  %1684 = vmatpush.msk.msra.mxu0 %vm88_vm0, %v49_v1  ;;  %v52_v4 = vld [vmem:[%s3077_s1 + $0x18] sm:$0x1f] }
   0xa   :  { %1693 = vmatpush.msk.msra.mxu1 %vm88_vm0, %v50_v2  ;;  %v41_v5 = vld [vmem:[%s3076_s0] sm:$0xff]  ;;  %1702 = vmatpush.msk.msra.mxu2 %vm88_vm0, %v51_v3  ;;  %v2066_v8 = vld [vmem:[#allocation3 + $0x1e8] sm:$0xff]  ;;  %v2074_v11 = vld [vmem:[#allocation3 + $0x1f0] sm:$0xff] }
   0xb   :  { %1711 = vmatpush.msk.msra.mxu3 %vm88_vm0, %v52_v4  ;;  %v2060_v6 = vld [vmem:[#allocation3 + $0x1f8] sm:$0xff]  ;;  %1685 = vmatmul.msk.f32.vlgmr.msra.gmra.mxu0 %vm63_vm1, %v41_v5  ;;  %v2064_v7 = vld [vmem:[#allocation3 + $0x1e0] sm:$0xff]  ;;  %v2078_v12 = vld [vmem:[#allocation3 + $0x1c8] sm:$0xff] }
   0xc   :  { %1694 = vmatmul.msk.f32.vlgmr.msra.gmra.mxu1 %vm63_vm1, %v41_v5  ;;  %1703 = vmatmul.msk.f32.vlgmr.msra.gmra.mxu2 %vm63_vm1, %v41_v5  ;;  %v2070_v9 = vld [vmem:[#allocation3 + $0x1d8] sm:$0xff]  ;;  %v2072_v10 = vld [vmem:[#allocation3 + $0x1c0] sm:$0xff]  ;;  %v2086_v15 = vld [vmem:[#allocation3 + $0x1d0] sm:$0xff] }
   0xd   :  { %1712 = vmatmul.msk.f32.vlgmr.msra.gmra.mxu3 %vm63_vm1, %v41_v5  ;;  %329 = vmatpush.msrb.mxu0 %v2064_v7  ;;  %v2080_v13 = vld [vmem:[#allocation3 + $0x1b8] sm:$0xff]  ;;  %v2084_v14 = vld [vmem:[#allocation3 + $0x1a0] sm:$0xff]  ;;  %v2090_v16 = vld [vmem:[#allocation3 + $0x1a8] sm:$0xff] }
   0xe   :  { %389 = vmatpush.msrb.mxu3 %v2060_v6  ;;  %349 = vmatpush.msrb.mxu1 %v2066_v8  ;;  %v2092_v17 = vld [vmem:[#allocation3 + $0x1b0] sm:$0xff]  ;;  %v42_v18 = vld [vmem:[%s3076_s0 + $0x8] sm:$0xff]  ;;  %v2101_v19 = vld [vmem:[#allocation3 + $0x198] sm:$0xff] }
   0xf   :  { %369 = vmatpush.msrb.mxu2 %v2074_v11  ;;  %330 = vmatpush.msrb.mxu0 %v2072_v10  ;;  %v2104_v20 = vld [vmem:[#allocation3 + $0x180] sm:$0xff]  ;;  %v2109_v21 = vld [vmem:[#allocation3 + $0x188] sm:$0xff]  ;;  %v2111_v22 = vld [vmem:[#allocation3 + $0x190] sm:$0xff] }
  0x10   :  { %390 = vmatpush.msrb.mxu3 %v2070_v9  ;;  %350 = vmatpush.msrb.mxu1 %v2078_v12  ;;  %v2115_v23 = vld [vmem:[#allocation3 + $0x178] sm:$0xff]  ;;  %v2117_v24 = vld [vmem:[#allocation3 + $0x160] sm:$0xff]  ;;  %v2121_v25 = vld [vmem:[#allocation3 + $0x168] sm:$0xff] }
  0x11   :  { %370 = vmatpush.msrb.mxu2 %v2086_v15  ;;  %331 = vmatpush.msrb.mxu0 %v2084_v14  ;;  %v2123_v26 = vld [vmem:[#allocation3 + $0x170] sm:$0xff]  ;;  %v2125_v27 = vld [vmem:[#allocation3 + $0x158] sm:$0xff]  ;;  %v2129_v28 = vld [vmem:[#allocation3 + $0x140] sm:$0xff] }
  0x12   :  { %391 = vmatpush.msrb.mxu3 %v2080_v13  ;;  %351 = vmatpush.msrb.mxu1 %v2090_v16  ;;  %v2133_v29 = vld [vmem:[#allocation3 + $0x148] sm:$0xff]  ;;  %v2135_v30 = vld [vmem:[#allocation3 + $0x150] sm:$0xff]  ;;  %v2144_v32 = vld [vmem:[#allocation3 + $0x138] sm:$0xff] }
  0x13   :  { %371 = vmatpush.msrb.mxu2 %v2092_v17  ;;  %1686 = vmatmul.msk.f32.gmra.mxu0 %vm63_vm1, %v42_v18  ;;  %v43_v31 = vld [vmem:[%s3076_s0 + $0x10] sm:$0xff]  ;;  %v2147_v33 = vld [vmem:[#allocation3 + $0x120] sm:$0xff]  ;;  %v2158_v36 = vld [vmem:[#allocation3 + $0x118] sm:$0xff] }
  0x14   :  { %1695 = vmatmul.msk.f32.gmra.mxu1 %vm63_vm1, %v42_v18  ;;  %1704 = vmatmul.msk.f32.gmra.mxu2 %vm63_vm1, %v42_v18  ;;  %v2152_v34 = vld [vmem:[#allocation3 + $0x128] sm:$0xff]  ;;  %v2154_v35 = vld [vmem:[#allocation3 + $0x130] sm:$0xff]  ;;  %v2160_v37 = vld [vmem:[#allocation3 + $0x100] sm:$0xff] }
  0x15   :  { %1713 = vmatmul.msk.f32.gmra.mxu3 %vm63_vm1, %v42_v18  ;;  %332 = vmatpush.msrb.mxu0 %v2104_v20  ;;  %v2164_v38 = vld [vmem:[#allocation3 + $0x108] sm:$0xff]  ;;  %v2166_v39 = vld [vmem:[#allocation3 + $0x110] sm:$0xff]  ;;  %v2168_v40 = vld [vmem:[#allocation3 + $0xf8] sm:$0xff] }
  0x16   :  { %392 = vmatpush.msrb.mxu3 %v2101_v19  ;;  %352 = vmatpush.msrb.mxu1 %v2109_v21  ;;  %3180 = vst [vmem:[#allocation6_spill] sm:$0xff] %v2168_v40  ;;  %v2172_v41 = vld [vmem:[#allocation3 + $0xe0] sm:$0xff]  ;;  %v2176_v42 = vld [vmem:[#allocation3 + $0xe8] sm:$0xff]  ;;  %v2178_v43 = vld [vmem:[#allocation3 + $0xf0] sm:$0xff] }
  0x17   :  { %372 = vmatpush.msrb.mxu2 %v2111_v22  ;;  %333 = vmatpush.msrb.mxu0 %v2117_v24  ;;  %3181 = vst [vmem:[#allocation7_spill] sm:$0xff] %v2176_v42  ;;  %v44_v44 = vld [vmem:[%s3076_s0 + $0x18] sm:$0xff]  ;;  %v2190_v46 = vld [vmem:[#allocation3 + $0xc0] sm:$0xff]  ;;  %v2195_v47 = vld [vmem:[#allocation3 + $0xc8] sm:$0xff] }
  0x18   :  { %393 = vmatpush.msrb.mxu3 %v2115_v23  ;;  %353 = vmatpush.msrb.mxu1 %v2121_v25  ;;  %3182 = vst [vmem:[#allocation8_spill] sm:$0xff] %v2178_v43  ;;  %v2187_v45 = vld [vmem:[#allocation3 + $0xd8] sm:$0xff]  ;;  %v2197_v48 = vld [vmem:[#allocation3 + $0xd0] sm:$0xff]  ;;  %v2203_v50 = vld [vmem:[#allocation3 + $0xa0] sm:$0xff] }
  0x19   :  { %373 = vmatpush.msrb.mxu2 %v2123_v26  ;;  %334 = vmatpush.msrb.mxu0 %v2129_v28  ;;  %3183 = vst [vmem:[#allocation9_spill] sm:$0xff] %v2187_v45  ;;  %v2201_v49 = vld [vmem:[#allocation3 + $0xb8] sm:$0xff]  ;;  %v2207_v51 = vld [vmem:[#allocation3 + $0xa8] sm:$0xff]  ;;  %v2209_v52 = vld [vmem:[#allocation3 + $0xb0] sm:$0xff] }
  0x1a   :  { %394 = vmatpush.msrb.mxu3 %v2125_v27  ;;  %354 = vmatpush.msrb.mxu1 %v2133_v29  ;;  %3184 = vst [vmem:[#allocation10_spill] sm:$0xff] %v2190_v46  ;;  %v2211_v53 = vld [vmem:[#allocation3 + $0x98] sm:$0xff]  ;;  %v2215_v54 = vld [vmem:[#allocation3 + $0x80] sm:$0xff]  ;;  %v2219_v55 = vld [vmem:[#allocation3 + $0x88] sm:$0xff] }
  0x1b   :  { %374 = vmatpush.msrb.mxu2 %v2135_v30  ;;  %1687 = vmatmul.msk.f32.gmra.mxu0 %vm63_vm1, %v43_v31  ;;  %3185 = vst [vmem:[#allocation11_spill] sm:$0xff] %v2195_v47  ;;  %v2221_v56 = vld [vmem:[#allocation3 + $0x90] sm:$0xff]  ;;  %v45_v57 = vld [vmem:[%s3076_s0 + $0x20] sm:$0xff]  ;;  %v2238_v60 = vld [vmem:[#allocation3 + $0x68] sm:$0xff] }
  0x1c   :  { %1696 = vmatmul.msk.f32.gmra.mxu1 %vm63_vm1, %v43_v31  ;;  %1705 = vmatmul.msk.f32.gmra.mxu2 %vm63_vm1, %v43_v31  ;;  %3186 = vst [vmem:[#allocation12_spill] sm:$0xff] %v2197_v48  ;;  %v2230_v58 = vld [vmem:[#allocation3 + $0x78] sm:$0xff]  ;;  %v2234_v59 = vld [vmem:[#allocation3 + $0x60] sm:$0xff]  ;;  %v2240_v61 = vld [vmem:[#allocation3 + $0x70] sm:$0xff] }
  0x1d   :  { %1714 = vmatmul.msk.f32.gmra.mxu3 %vm63_vm1, %v43_v31  ;;  %335 = vmatpush.msrb.mxu0 %v2147_v33  ;;  %3187 = vst [vmem:[#allocation13_spill] sm:$0xff] %v2201_v49  ;;  %v2244_v62 = vld [vmem:[#allocation3 + $0x58] sm:$0xff]  ;;  %v2246_v63 = vld [vmem:[#allocation3 + $0x40] sm:$0xff]  ;;  %v2250_v0 = vld [vmem:[#allocation3 + $0x48] sm:$0xff] }
  0x1e   :  { %395 = vmatpush.msrb.mxu3 %v2144_v32  ;;  %355 = vmatpush.msrb.mxu1 %v2152_v34  ;;  %3188 = vst [vmem:[#allocation14_spill] sm:$0xff] %v2203_v50  ;;  %v2252_v1 = vld [vmem:[#allocation3 + $0x50] sm:$0xff]  ;;  %v2254_v2 = vld [vmem:[#allocation3 + $0x38] sm:$0xff]  ;;  %v2258_v3 = vld [vmem:[#allocation3 + $0x20] sm:$0xff] }
  0x1f   :  { %375 = vmatpush.msrb.mxu2 %v2154_v35  ;;  %336 = vmatpush.msrb.mxu0 %v2160_v37  ;;  %3189 = vst [vmem:[#allocation15_spill] sm:$0xff] %v2207_v51  ;;  %v2262_v4 = vld [vmem:[#allocation3 + $0x28] sm:$0xff]  ;;  %v2264_v5 = vld [vmem:[#allocation3 + $0x30] sm:$0xff]  ;;  %v2273_v31 = vld [vmem:[#allocation3 + $0x18] sm:$0xff] }
  0x20   :  { %396 = vmatpush.msrb.mxu3 %v2158_v36  ;;  %356 = vmatpush.msrb.mxu1 %v2164_v38  ;;  %3190 = vst [vmem:[#allocation16_spill] sm:$0xff] %v2209_v52  ;;  %v46_v18 = vld [vmem:[%s3076_s0 + $0x28] sm:$0xff] }
  0x21   :  { %376 = vmatpush.msrb.mxu2 %v2166_v39  ;;  %337 = vmatpush.msrb.mxu0 %v2172_v41  ;;  %3191 = vst [vmem:[#allocation17_spill] sm:$0xff] %v2211_v53 }
  0x22   :  { %397 = vmatpush.msrb.mxu3 %v2168_v40  ;;  %357 = vmatpush.msrb.mxu1 %v2176_v42  ;;  %3192 = vst [vmem:[#allocation18_spill] sm:$0xff] %v2215_v54 }
  0x23   :  { %377 = vmatpush.msrb.mxu2 %v2178_v43  ;;  %1688 = vmatmul.msk.f32.gmra.mxu0 %vm63_vm1, %v44_v44  ;;  %3193 = vst [vmem:[#allocation19_spill] sm:$0xff] %v2219_v55 }
  0x24   :  { %1697 = vmatmul.msk.f32.gmra.mxu1 %vm63_vm1, %v44_v44  ;;  %1706 = vmatmul.msk.f32.gmra.mxu2 %vm63_vm1, %v44_v44  ;;  %3194 = vst [vmem:[#allocation20_spill] sm:$0xff] %v2221_v56 }
  0x25   :  { %1715 = vmatmul.msk.f32.gmra.mxu3 %vm63_vm1, %v44_v44  ;;  %338 = vmatpush.msrb.mxu0 %v2190_v46  ;;  %3195 = vst [vmem:[#allocation21_spill] sm:$0xff] %v2230_v58  ;;  %v2277_v44 = vld [vmem:[#allocation3] sm:$0xff] }
  0x26   :  { %398 = vmatpush.msrb.mxu3 %v2187_v45  ;;  %358 = vmatpush.msrb.mxu1 %v2195_v47  ;;  %3196 = vst [vmem:[#allocation22_spill] sm:$0xff] %v2234_v59 }
  0x27   :  { %378 = vmatpush.msrb.mxu2 %v2197_v48  ;;  %339 = vmatpush.msrb.mxu0 %v2203_v50  ;;  %3197 = vst [vmem:[#allocation23_spill] sm:$0xff] %v2238_v60 }
  0x28   :  { %399 = vmatpush.msrb.mxu3 %v2201_v49  ;;  %359 = vmatpush.msrb.mxu1 %v2207_v51  ;;  %3198 = vst [vmem:[#allocation24_spill] sm:$0xff] %v2240_v61 }
  0x29   :  { %379 = vmatpush.msrb.mxu2 %v2209_v52  ;;  %340 = vmatpush.msrb.mxu0 %v2215_v54  ;;  %3199 = vst [vmem:[#allocation25_spill] sm:$0xff] %v2244_v62 }
  0x2a   :  { %400 = vmatpush.msrb.mxu3 %v2211_v53  ;;  %360 = vmatpush.msrb.mxu1 %v2219_v55  ;;  %3200 = vst [vmem:[#allocation26_spill] sm:$0xff] %v2246_v63 }
  0x2b   :  { %380 = vmatpush.msrb.mxu2 %v2221_v56  ;;  %1689 = vmatmul.msk.f32.gmra.mxu0 %vm63_vm1, %v45_v57  ;;  %3201 = vst [vmem:[#allocation27_spill] sm:$0xff] %v2250_v0 }
  0x2c   :  { %1698 = vmatmul.msk.f32.gmra.mxu1 %vm63_vm1, %v45_v57  ;;  %1707 = vmatmul.msk.f32.gmra.mxu2 %vm63_vm1, %v45_v57  ;;  %3202 = vst [vmem:[#allocation28_spill] sm:$0xff] %v2252_v1 }
  0x2d   :  { %1716 = vmatmul.msk.f32.gmra.mxu3 %vm63_vm1, %v45_v57  ;;  %341 = vmatpush.msrb.mxu0 %v2234_v59  ;;  %3203 = vst [vmem:[#allocation29_spill] sm:$0xff] %v2254_v2  ;;  %v2281_v57 = vld [vmem:[#allocation3 + $0x8] sm:$0xff] }
  0x2e   :  { %401 = vmatpush.msrb.mxu3 %v2230_v58  ;;  %361 = vmatpush.msrb.mxu1 %v2238_v60  ;;  %3204 = vst [vmem:[#allocation30_spill] sm:$0xff] %v2258_v3 }
  0x2f   :  { %381 = vmatpush.msrb.mxu2 %v2240_v61  ;;  %342 = vmatpush.msrb.mxu0 %v2246_v63  ;;  %3205 = vst [vmem:[#allocation31_spill] sm:$0xff] %v2262_v4 }
  0x30   :  { %402 = vmatpush.msrb.mxu3 %v2244_v62  ;;  %3206 = vst [vmem:[#allocation32_spill] sm:$0xff] %v2264_v5  ;;  %362 = vmatpush.msrb.mxu1 %v2250_v0  ;;  %v2283_v62 = vld [vmem:[#allocation3 + $0x10] sm:$0xff] }
  0x31   :  { %382 = vmatpush.msrb.mxu2 %v2252_v1  ;;  %343 = vmatpush.msrb.mxu0 %v2258_v3  ;;  %3207 = vst [vmem:[#allocation33_spill] sm:$0xff] %v2273_v31 }
  0x32   :  { %403 = vmatpush.msrb.mxu3 %v2254_v2  ;;  %363 = vmatpush.msrb.mxu1 %v2262_v4  ;;  %3208 = vst [vmem:[#allocation34_spill] sm:$0xff] %v2277_v44  ;;  %v47_v2 = vld [vmem:[%s3076_s0 + $0x30] sm:$0xff] }
  0x33   :  { %383 = vmatpush.msrb.mxu2 %v2264_v5  ;;  %1690 = vmatmul.msk.f32.gmra.mxu0 %vm63_vm1, %v46_v18  ;;  %3209 = vst [vmem:[#allocation35_spill] sm:$0xff] %v2281_v57 }
  0x34   :  { %1699 = vmatmul.msk.f32.gmra.mxu1 %vm63_vm1, %v46_v18  ;;  %3210 = vst [vmem:[#allocation36_spill] sm:$0xff] %v2283_v62  ;;  %1708 = vmatmul.msk.f32.gmra.mxu2 %vm63_vm1, %v46_v18 }
  0x35   :  { %1717 = vmatmul.msk.f32.gmra.mxu3 %vm63_vm1, %v46_v18  ;;  %344 = vmatpush.msrb.mxu0 %v2277_v44  ;;  %v48_v18 = vld [vmem:[%s3076_s0 + $0x38] sm:$0xff] }
  0x36   :  { %404 = vmatpush.msrb.mxu3 %v2273_v31  ;;  %364 = vmatpush.msrb.mxu1 %v2281_v57 }
  0x37   :  { %384 = vmatpush.msrb.mxu2 %v2283_v62  ;;  %496 = vmatpush.msra.mxu0 %v2064_v7 }
  0x38   :  { %516 = vmatpush.msra.mxu1 %v2066_v8  ;;  %556 = vmatpush.msra.mxu3 %v2060_v6 }
  0x39   :  { %536 = vmatpush.msra.mxu2 %v2074_v11  ;;  %497 = vmatpush.msra.mxu0 %v2072_v10 }
  0x3a   :  { %517 = vmatpush.msra.mxu1 %v2078_v12  ;;  %557 = vmatpush.msra.mxu3 %v2070_v9 }
  0x3b   :  { %537 = vmatpush.msra.mxu2 %v2086_v15  ;;  %1691 = vmatmul.msk.f32.gmra.mxu0 %vm63_vm1, %v47_v2 }
  0x3c   :  { %1700 = vmatmul.msk.f32.gmra.mxu1 %vm63_vm1, %v47_v2  ;;  %1709 = vmatmul.msk.f32.gmra.mxu2 %vm63_vm1, %v47_v2 }
  0x3d   :  { %1718 = vmatmul.msk.f32.gmra.mxu3 %vm63_vm1, %v47_v2  ;;  %498 = vmatpush.msra.mxu0 %v2084_v14  ;;  %v2003_v2 = vmov 0.0  }
  0x3e   :  { %518 = vmatpush.msra.mxu1 %v2090_v16  ;;  %538 = vmatpush.msra.mxu2 %v2092_v17 }
  0x3f   :  { %558 = vmatpush.msra.mxu3 %v2080_v13  ;;  %499 = vmatpush.msra.mxu0 %v2104_v20 }
  0x40   :  { %519 = vmatpush.msra.mxu1 %v2109_v21  ;;  %539 = vmatpush.msra.mxu2 %v2111_v22 }
  0x41   :  { %559 = vmatpush.msra.mxu3 %v2101_v19  ;;  %500 = vmatpush.msra.mxu0 %v2117_v24 }
  0x42   :  { %520 = vmatpush.msra.mxu1 %v2121_v25  ;;  %540 = vmatpush.msra.mxu2 %v2123_v26 }
  0x43   :  { %560 = vmatpush.msra.mxu3 %v2115_v23  ;;  %1692 = vmatmul.msk.f32.gmra.mxu0 %vm63_vm1, %v48_v18 }
  0x44   :  { %1701 = vmatmul.msk.f32.gmra.mxu1 %vm63_vm1, %v48_v18  ;;  %1710 = vmatmul.msk.f32.gmra.mxu2 %vm63_vm1, %v48_v18 }
  0x45   :  { %1719 = vmatmul.msk.f32.gmra.mxu3 %vm63_vm1, %v48_v18  ;;  %501 = vmatpush.msra.mxu0 %v2129_v28  ;;  %v3211_v18 = vld [vmem:[#allocation25_spill] sm:$0xff] }
  0x46   :  { %521 = vmatpush.msra.mxu1 %v2133_v29  ;;  %541 = vmatpush.msra.mxu2 %v2135_v30 }
  0x47   :  { %561 = vmatpush.msra.mxu3 %v2125_v27  ;;  %502 = vmatpush.msra.mxu0 %v2147_v33 }
  0x48   :  { %522 = vmatpush.msra.mxu1 %v2152_v34  ;;  %542 = vmatpush.msra.mxu2 %v2154_v35 }
  0x49   :  { %562 = vmatpush.msra.mxu3 %v2144_v32  ;;  %503 = vmatpush.msra.mxu0 %v2160_v37 }
  0x4a   :  { %523 = vmatpush.msra.mxu1 %v2164_v38  ;;  %543 = vmatpush.msra.mxu2 %v2166_v39 }
  0x4b   :  { %563 = vmatpush.msra.mxu3 %v2158_v36  ;;  %345 = vmatmul.f32.vlgmr.msrb.gmra.mxu0 %v2003_v2 }
  0x4c   :  { %365 = vmatmul.f32.vlgmr.msrb.gmra.mxu1 %v2003_v2  ;;  %385 = vmatmul.f32.vlgmr.msrb.gmra.mxu2 %v2003_v2 }
  0x4d   :  { %405 = vmatmul.f32.vlgmr.msrb.gmra.mxu3 %v2003_v2  ;;  %504 = vmatpush.msra.mxu0 %v2172_v41  ;;  %v3212_v2 = vld [vmem:[#allocation29_spill] sm:$0xff] }
  0x4e   :  { %524 = vmatpush.msra.mxu1 %v2176_v42  ;;  %544 = vmatpush.msra.mxu2 %v2178_v43 }
  0x4f   :  { %564 = vmatpush.msra.mxu3 %v2168_v40  ;;  %505 = vmatpush.msra.mxu0 %v2190_v46 }
  0x50   :  { %525 = vmatpush.msra.mxu1 %v2195_v47  ;;  %545 = vmatpush.msra.mxu2 %v2197_v48 }
  0x51   :  { %565 = vmatpush.msra.mxu3 %v2187_v45  ;;  %506 = vmatpush.msra.mxu0 %v2203_v50 }
  0x52   :  { %526 = vmatpush.msra.mxu1 %v2207_v51  ;;  %546 = vmatpush.msra.mxu2 %v2209_v52 }
  0x53   :  { %566 = vmatpush.msra.mxu3 %v2201_v49  ;;  %507 = vmatpush.msra.mxu0 %v2215_v54 }
  0x54   :  { %527 = vmatpush.msra.mxu1 %v2219_v55  ;;  %547 = vmatpush.msra.mxu2 %v2221_v56 }
  0x55   :  { %567 = vmatpush.msra.mxu3 %v2211_v53  ;;  %508 = vmatpush.msra.mxu0 %v2234_v59 }
  0x56   :  { %528 = vmatpush.msra.mxu1 %v2238_v60  ;;  %548 = vmatpush.msra.mxu2 %v2240_v61 }
  0x57   :  { %568 = vmatpush.msra.mxu3 %v2230_v58  ;;  %509 = vmatpush.msra.mxu0 %v2246_v63 }
  0x58   :  { %529 = vmatpush.msra.mxu1 %v2250_v0  ;;  %549 = vmatpush.msra.mxu2 %v2252_v1 }
  0x59   :  { %569 = vmatpush.msra.mxu3 %v3211_v18  ;;  %510 = vmatpush.msra.mxu0 %v2258_v3 }
  0x5a   :  { %530 = vmatpush.msra.mxu1 %v2262_v4  ;;  %550 = vmatpush.msra.mxu2 %v2264_v5 }
  0x5b   :  { %570 = vmatpush.msra.mxu3 %v3212_v2  ;;  %511 = vmatpush.msra.mxu0 %v2277_v44 }
  0x5c   :  { %531 = vmatpush.msra.mxu1 %v2281_v57  ;;  %551 = vmatpush.msra.mxu2 %v2283_v62 }
  0x5d   :  { %571 = vmatpush.msra.mxu3 %v2273_v31  ;;  %663 = vmatpush.msrb.mxu0 %v2064_v7 }
  0x5e   :  { %683 = vmatpush.msrb.mxu1 %v2066_v8  ;;  %703 = vmatpush.msrb.mxu2 %v2074_v11 }
  0x5f   :  { %723 = vmatpush.msrb.mxu3 %v2060_v6  ;;  %664 = vmatpush.msrb.mxu0 %v2072_v10 }
  0x60   :  { %684 = vmatpush.msrb.mxu1 %v2078_v12  ;;  %704 = vmatpush.msrb.mxu2 %v2086_v15 }
  0x61   :  { %724 = vmatpush.msrb.mxu3 %v2070_v9  ;;  %665 = vmatpush.msrb.mxu0 %v2084_v14 }
  0x62   :  { %685 = vmatpush.msrb.mxu1 %v2090_v16  ;;  %705 = vmatpush.msrb.mxu2 %v2092_v17 }
  0x63   :  { %725 = vmatpush.msrb.mxu3 %v2080_v13  ;;  %666 = vmatpush.msrb.mxu0 %v2104_v20 }
  0x64   :  { %686 = vmatpush.msrb.mxu1 %v2109_v21  ;;  %706 = vmatpush.msrb.mxu2 %v2111_v22 }
  0x65   :  { %726 = vmatpush.msrb.mxu3 %v2101_v19  ;;  %667 = vmatpush.msrb.mxu0 %v2117_v24 }
  0x66   :  { %687 = vmatpush.msrb.mxu1 %v2121_v25  ;;  %707 = vmatpush.msrb.mxu2 %v2123_v26 }
  0x67   :  { %727 = vmatpush.msrb.mxu3 %v2115_v23  ;;  %668 = vmatpush.msrb.mxu0 %v2129_v28 }
  0x68   :  { %688 = vmatpush.msrb.mxu1 %v2133_v29  ;;  %708 = vmatpush.msrb.mxu2 %v2135_v30 }
  0x69   :  { %728 = vmatpush.msrb.mxu3 %v2125_v27  ;;  %669 = vmatpush.msrb.mxu0 %v2147_v33 }
  0x6a   :  { %689 = vmatpush.msrb.mxu1 %v2152_v34  ;;  %709 = vmatpush.msrb.mxu2 %v2154_v35 }
  0x6b   :  { %729 = vmatpush.msrb.mxu3 %v2144_v32  ;;  %670 = vmatpush.msrb.mxu0 %v2160_v37 }
  0x6c   :  { %690 = vmatpush.msrb.mxu1 %v2164_v38  ;;  %710 = vmatpush.msrb.mxu2 %v2166_v39 }
  0x6d   :  { %730 = vmatpush.msrb.mxu3 %v2158_v36  ;;  %671 = vmatpush.msrb.mxu0 %v2172_v41 }
  0x6e   :  { %691 = vmatpush.msrb.mxu1 %v2176_v42  ;;  %711 = vmatpush.msrb.mxu2 %v2178_v43 }
  0x6f   :  { %731 = vmatpush.msrb.mxu3 %v2168_v40  ;;  %672 = vmatpush.msrb.mxu0 %v2190_v46 }
  0x70   :  { %692 = vmatpush.msrb.mxu1 %v2195_v47  ;;  %712 = vmatpush.msrb.mxu2 %v2197_v48 }
  0x71   :  { %732 = vmatpush.msrb.mxu3 %v2187_v45  ;;  %673 = vmatpush.msrb.mxu0 %v2203_v50 }
  0x72   :  { %693 = vmatpush.msrb.mxu1 %v2207_v51  ;;  %713 = vmatpush.msrb.mxu2 %v2209_v52 }
  0x73   :  { %733 = vmatpush.msrb.mxu3 %v2201_v49  ;;  %674 = vmatpush.msrb.mxu0 %v2215_v54 }
  0x74   :  { %694 = vmatpush.msrb.mxu1 %v2219_v55  ;;  %714 = vmatpush.msrb.mxu2 %v2221_v56 }
  0x75   :  { %734 = vmatpush.msrb.mxu3 %v2211_v53  ;;  %675 = vmatpush.msrb.mxu0 %v2234_v59 }
  0x76   :  { %695 = vmatpush.msrb.mxu1 %v2238_v60  ;;  %715 = vmatpush.msrb.mxu2 %v2240_v61 }
  0x77   :  { %735 = vmatpush.msrb.mxu3 %v2230_v58  ;;  %676 = vmatpush.msrb.mxu0 %v2246_v63 }
  0x78   :  { %696 = vmatpush.msrb.mxu1 %v2250_v0  ;;  %716 = vmatpush.msrb.mxu2 %v2252_v1 }
  0x79   :  { %736 = vmatpush.msrb.mxu3 %v3211_v18  ;;  %677 = vmatpush.msrb.mxu0 %v2258_v3  ;;  %v53_v3 = vld [vmem:[%s3079_s3] sm:$0xf] }
  0x7a   :  { %697 = vmatpush.msrb.mxu1 %v2262_v4  ;;  %717 = vmatpush.msrb.mxu2 %v2264_v5  ;;  %v55_v18 = vperm.slane %v53_v3, 0  ;;  %v56_v4 = vperm.slane %v53_v3, 1 }
  0x7b   :  { %737 = vmatpush.msrb.mxu3 %v3212_v2  ;;  %678 = vmatpush.msrb.mxu0 %v2277_v44 }
  0x7c   :  { %698 = vmatpush.msrb.mxu1 %v2281_v57  ;;  %718 = vmatpush.msrb.mxu2 %v2283_v62  ;;  %v2444_v62 = vperm.slane %v53_v3, 2 }
  0x7d   :  { %738 = vmatpush.msrb.mxu3 %v2273_v31  ;;  %v2446_v31 = vperm.slane %v53_v3, 3 }
  0x88   :  { %v118_v0 = vpop.f32.mrf.mxu0 }
  0x89   :  { %v159_v1 = vpop.f32.mrf.mxu1 }
  0x8f   :  { %v2436_v63 = vpop.f32.mrf.mxu2 }
  0x90   :  { %v2438_v5 = vpop.f32.mrf.mxu3  ;;  %v121_v2 = vpop.f32.mrf.mxu0 }
  0x91   :  { %v162_v44 = vpop.f32.mrf.mxu1  ;;  %v2440_v58 = vadd.f32 %v121_v2, %v55_v18 }
  0x92   :  { %v2442_v57 = vadd.f32 %v162_v44, %v56_v4 }
  0x93   :  { %3213 = vst [vmem:[#allocation37_spill] sm:$0xff] %v2440_v58 }
  0x94   :  { %3214 = vst [vmem:[#allocation38_spill] sm:$0xff] %v2442_v57 }
  0x97   :  { %v203_v61 = vpop.f32.mrf.mxu2 }
  0x98   :  { %v244_v60 = vpop.f32.mrf.mxu3  ;;  %v2449_v59 = vadd.f32 %v203_v61, %v2444_v62  ;;  %v124_v56 = vpop.f32.mrf.mxu0 }
  0x99   :  { %v2452_v53 = vadd.f32 %v244_v60, %v2446_v31  ;;  %v165_v55 = vpop.f32.mrf.mxu1  ;;  %v2454_v54 = vadd.f32 %v124_v56, %v55_v18 }
  0x9a   :  { %3215 = vst [vmem:[#allocation39_spill] sm:$0xff] %v2449_v59  ;;  %v2456_v2 = vadd.f32 %v165_v55, %v56_v4 }
  0x9b   :  { %3216 = vst [vmem:[#allocation40_spill] sm:$0xff] %v2452_v53 }
  0x9c   :  { %3217 = vst [vmem:[#allocation41_spill] sm:$0xff] %v2454_v54 }
  0x9d   :  { %3218 = vst [vmem:[#allocation42_spill] sm:$0xff] %v2456_v2 }
  0x9f   :  { %v206_v44 = vpop.f32.mrf.mxu2 }
  0xa0   :  { %v247_v57 = vpop.f32.mrf.mxu3  ;;  %v2459_v58 = vadd.f32 %v206_v44, %v2444_v62  ;;  %v127_v49 = vpop.f32.mrf.mxu0 }
  0xa1   :  { %v2462_v3 = vadd.f32 %v247_v57, %v2446_v31  ;;  %v168_v61 = vpop.f32.mrf.mxu1  ;;  %v2464_v59 = vadd.f32 %v127_v49, %v55_v18 }
  0xa2   :  { %3219 = vst [vmem:[#allocation43_spill] sm:$0xff] %v2459_v58  ;;  %v2466_v60 = vadd.f32 %v168_v61, %v56_v4 }
  0xa3   :  { %3220 = vst [vmem:[#allocation44_spill] sm:$0xff] %v2462_v3 }
  0xa4   :  { %3221 = vst [vmem:[#allocation45_spill] sm:$0xff] %v2464_v59 }
  0xa5   :  { %3222 = vst [vmem:[#allocation46_spill] sm:$0xff] %v2466_v60 }
  0xa7   :  { %v209_v53 = vpop.f32.mrf.mxu2 }
  0xa8   :  { %v250_v52 = vpop.f32.mrf.mxu3  ;;  %v2469_v56 = vadd.f32 %v209_v53, %v2444_v62  ;;  %v130_v2 = vpop.f32.mrf.mxu0 }
  0xa9   :  { %v2472_v55 = vadd.f32 %v250_v52, %v2446_v31  ;;  %v171_v44 = vpop.f32.mrf.mxu1  ;;  %v2474_v58 = vadd.f32 %v130_v2, %v55_v18 }
  0xaa   :  { %3223 = vst [vmem:[#allocation47_spill] sm:$0xff] %v2469_v56  ;;  %v2476_v57 = vadd.f32 %v171_v44, %v56_v4 }
  0xab   :  { %3224 = vst [vmem:[#allocation48_spill] sm:$0xff] %v2472_v55 }
  0xac   :  { %3225 = vst [vmem:[#allocation49_spill] sm:$0xff] %v2474_v58 }
  0xad   :  { %3226 = vst [vmem:[#allocation50_spill] sm:$0xff] %v2476_v57 }
  0xaf   :  { %v212_v3 = vpop.f32.mrf.mxu2 }
  0xb0   :  { %v253_v54 = vpop.f32.mrf.mxu3  ;;  %v2479_v49 = vadd.f32 %v212_v3, %v2444_v62  ;;  %v133_v60 = vpop.f32.mrf.mxu0 }
  0xb1   :  { %v2482_v61 = vadd.f32 %v253_v54, %v2446_v31  ;;  %v174_v53 = vpop.f32.mrf.mxu1  ;;  %v2484_v56 = vadd.f32 %v133_v60, %v55_v18 }
  0xb2   :  { %3227 = vst [vmem:[#allocation51_spill] sm:$0xff] %v2479_v49  ;;  %v2486_v52 = vadd.f32 %v174_v53, %v56_v4 }
  0xb3   :  { %3228 = vst [vmem:[#allocation52_spill] sm:$0xff] %v2482_v61 }
  0xb4   :  { %3229 = vst [vmem:[#allocation53_spill] sm:$0xff] %v2484_v56  ;;  %v160_v56 = vadd.f32 %v159_v1, %v56_v4 }
  0xb5   :  { %3230 = vst [vmem:[#allocation54_spill] sm:$0xff] %v2486_v52 }
  0xb7   :  { %v215_v55 = vpop.f32.mrf.mxu2 }
  0xb8   :  { %v256_v59 = vpop.f32.mrf.mxu3  ;;  %v2489_v2 = vadd.f32 %v215_v55, %v2444_v62  ;;  %v136_v57 = vpop.f32.mrf.mxu0 }
  0xb9   :  { %v2492_v44 = vadd.f32 %v256_v59, %v2446_v31  ;;  %v177_v3 = vpop.f32.mrf.mxu1  ;;  %v2494_v49 = vadd.f32 %v136_v57, %v55_v18 }
  0xba   :  { %3231 = vst [vmem:[#allocation55_spill] sm:$0xff] %v2489_v2  ;;  %v2496_v54 = vadd.f32 %v177_v3, %v56_v4 }
  0xbb   :  { %3232 = vst [vmem:[#allocation56_spill] sm:$0xff] %v2492_v44  ;;  %v119_v44 = vadd.f32 %v118_v0, %v55_v18  ;;  %v242_v0 = vadd.f32 %v2438_v5, %v2446_v31 }
  0xbc   :  { %3233 = vst [vmem:[#allocation57_spill] sm:$0xff] %v2494_v49 }
  0xbd   :  { %3234 = vst [vmem:[#allocation58_spill] sm:$0xff] %v2496_v54 }
  0xbf   :  { %v218_v61 = vpop.f32.mrf.mxu2 }
  0xc0   :  { %v259_v58 = vpop.f32.mrf.mxu3  ;;  %v2499_v60 = vadd.f32 %v218_v61, %v2444_v62  ;;  %v139_v52 = vpop.f32.mrf.mxu0 }
  0xc1   :  { %v2502_v53 = vadd.f32 %v259_v58, %v2446_v31  ;;  %v180_v55 = vpop.f32.mrf.mxu1  ;;  %v2504_v2 = vadd.f32 %v139_v52, %v55_v18  ;;  %v201_v52 = vadd.f32 %v2436_v63, %v2444_v62 }
  0xc2   :  { %3235 = vst [vmem:[#allocation59_spill] sm:$0xff] %v2499_v60  ;;  %v2506_v59 = vadd.f32 %v180_v55, %v56_v4 }
  0xc3   :  { %3236 = vst [vmem:[#allocation60_spill] sm:$0xff] %v2502_v53 }
  0xc4   :  { %3237 = vst [vmem:[#allocation61_spill] sm:$0xff] %v2504_v2 }
  0xc5   :  { %3238 = vst [vmem:[#allocation62_spill] sm:$0xff] %v2506_v59 }
  0xc7   :  { %v221_v57 = vpop.f32.mrf.mxu2 }
  0xc8   :  { %v262_v49 = vpop.f32.mrf.mxu3  ;;  %v2509_v3 = vadd.f32 %v221_v57, %v2444_v62  ;;  %v346_v61 = vpop.f32.mrf.mxu0 }
  0xc9   :  { %v2512_v54 = vadd.f32 %v262_v49, %v2446_v31  ;;  %v366_v60 = vpop.f32.mrf.mxu1  ;;  %v409_v58 = vadd.f32 %v346_v61, %v119_v44 }
  0xca   :  { %3239 = vst [vmem:[#allocation63_spill] sm:$0xff] %v2509_v3  ;;  %v410_v53 = vadd.f32 %v366_v60, %v160_v56 }
  0xcb   :  { %3240 = vst [vmem:[#allocation64_spill] sm:$0xff] %v2512_v54  ;;  %v1720_v51 = vmul.f32 -1.442695, %v409_v58 }
  0xcc   :  { %v1721_v50 = vmul.f32 -1.442695, %v410_v53 }
  0xcd   :  { %1766 = vpow2.f32 %v1720_v51 }
  0xce   :  { %1768 = vpow2.f32 %v1721_v50 }
  0xcf   :  { %v386_v1 = vpop.f32.mrf.mxu2 }
  0xd0   :  { %v406_v4 = vpop.f32.mrf.mxu3  ;;  %v411_v18 = vadd.f32 %v386_v1, %v201_v52 }
  0xd1   :  { %v412_v55 = vadd.f32 %v406_v4, %v242_v0 }
  0xd2   :  { %v1722_v49 = vmul.f32 -1.442695, %v411_v18 }
  0xd3   :  { %v1723_v57 = vmul.f32 -1.442695, %v412_v55  ;;  %v1767_v54 = vpop.eup %1766 }
  0xd4   :  { %v1769_v3 = vpop.eup %1768  ;;  %v425_v44 = vadd.f32 1.0, %v1767_v54  ;;  %1770 = vpow2.f32 %v1722_v49 }
  0xd5   :  { %v426_v56 = vadd.f32 1.0, %v1769_v3  ;;  %1772 = vpow2.f32 %v1723_v57 }
  0xd6   :  { %1774 = vrcp.f32 %v425_v44  ;;  %vm434_vm8 = vweird.f32 %v425_v44 }
  0xd7   :  { %1776 = vrcp.f32 %v426_v56  ;;  %vm449_vm4 = vweird.f32 %v426_v56 }
  0xda   :  { %v1771_v51 = vpop.eup %1770 }
  0xdb   :  { %v1773_v62 = vpop.eup %1772  ;;  %v427_v50 = vadd.f32 1.0, %v1771_v51  ;;  %v453_v51 = vand.u32 2147483647, %v426_v56 }
  0xdc   :  { %v1775_v63 = vpop.eup %1774  ;;  %v428_v60 = vadd.f32 1.0, %v1773_v62  ;;  %v455_v62 = vand.u32 2147483648, %v426_v56 }
  0xdd   :  { %v1777_v5 = vpop.eup %1776  ;;  %v430_v53 = vmul.f32 %v1775_v63, %v425_v44  ;;  %vm435_vm5 = vweird.f32 %v1775_v63  ;;  %vm454_vm12 = vcmp.eq.f32.partialorder %v453_v51, 8.507059e+37  ;;  %vm464_vm15 = vweird.f32 %v427_v50 }
  0xde   :  { %v445_v31 = vmul.f32 %v1777_v5, %v426_v56  ;;  %1778 = vrcp.f32 %v428_v60  ;;  %vm450_vm2 = vweird.f32 %v1777_v5  ;;  %v485_v18 = vand.u32 2147483648, %v428_v60  ;;  %vm436_vm11 = vmor %vm434_vm8, %vm435_vm5 }
  0xdf   :  { %1780 = vrcp.f32 %v427_v50  ;;  %v431_v58 = vsub.f32 1.0, %v430_v53  ;;  %v483_v57 = vand.u32 2147483647, %v428_v60  ;;  %vm2518_vm6 = vmor %vm449_vm4, %vm450_vm2  ;;  %vm479_vm7 = vweird.f32 %v428_v60 }
  0xe0   :  { %v446_v61 = vsub.f32 1.0, %v445_v31  ;;  %v456_v56 = vor.u32 1.1754944e-38, %v455_v62  ;;  %v3276_v62 = vld [vmem:[#allocation39_spill] sm:$0xff] }
  0xe1   :  { %v432_v3 = vmul.f32 %v1775_v63, %v431_v58  ;;  %v486_v58 = vor.u32 1.1754944e-38, %v485_v18  ;;  %vm484_vm10 = vcmp.eq.f32.partialorder %v483_v57, 8.507059e+37 }
  0xe2   :  { %v447_v0 = vmul.f32 %v1777_v5, %v446_v61  ;;  %v440_v61 = vand.u32 2147483648, %v425_v44 }
  0xe3   :  { %v433_v2 = vadd.f32 %v1775_v63, %v432_v3 }
  0xe4   :  { %v1779_v52 = vpop.eup %1778  ;;  %v448_v55 = vadd.f32 %v1777_v5, %v447_v0  ;;  %v438_v0 = vand.u32 2147483647, %v425_v44  ;;  %v441_v46 = vor.u32 1.1754944e-38, %v440_v61 }
  0xe5   :  { %v475_v54 = vmul.f32 %v1779_v52, %v428_v60  ;;  %v1781_v1 = vpop.eup %1780  ;;  %vm480_vm3 = vweird.f32 %v1779_v52  ;;  %v437_v48 = vsel %vm436_vm11, %v1775_v63, %v433_v2 }
  0xe6   :  { %v460_v59 = vmul.f32 %v1781_v1, %v427_v50  ;;  %vm481_vm9 = vmor %vm479_vm7, %vm480_vm3  ;;  %vm439_vm13 = vcmp.eq.f32.partialorder %v438_v0, 8.507059e+37  ;;  %vm465_vm14 = vweird.f32 %v1781_v1 }
  0xe7   :  { %v476_v4 = vsub.f32 1.0, %v475_v54  ;;  %v452_v54 = vsel %vm2518_vm6, %v1777_v5, %v448_v55  ;;  %v442_v40 = vsel %vm439_vm13, %v441_v46, %v437_v48  ;;  %vm466_vm0 = vmor %vm464_vm15, %vm465_vm14  ;;  %v3275_v46 = vld [vmem:[#allocation38_spill] sm:$0xff] }
  0xe8   :  { %v461_v3 = vsub.f32 1.0, %v460_v59  ;;  %v468_v59 = vand.u32 2147483647, %v427_v50 }
  0xe9   :  { %v477_v49 = vmul.f32 %v1779_v52, %v476_v4 }
  0xea   :  { %v462_v43 = vmul.f32 %v1781_v1, %v461_v3  ;;  %vm469_vm1 = vcmp.eq.f32.partialorder %v468_v59, 8.507059e+37 }
  0xeb   :  { %v478_v53 = vadd.f32 %v1779_v52, %v477_v49  ;;  %v457_v49 = vsel %vm454_vm12, %v456_v56, %v452_v54 }
  0xec   :  { %v491_v18 = vmul.f32 0.0, %v457_v49  ;;  %v463_v5 = vadd.f32 %v1781_v1, %v462_v43 }
  0xed   :  { %v482_v4 = vsel %vm481_vm9, %v1779_v52, %v478_v53  ;;  %v470_v52 = vand.u32 2147483648, %v427_v50  ;;  %v3277_v53 = vld [vmem:[#allocation40_spill] sm:$0xff] }
  0xee   :  { %v487_v45 = vsel %vm484_vm10, %v486_v58, %v482_v4  ;;  %v467_v2 = vsel %vm466_vm0, %v1781_v1, %v463_v5 }
  0xef   :  { %v489_v47 = vmul.f32 2.0, %v487_v45  ;;  %v471_v45 = vor.u32 1.1754944e-38, %v470_v52 }
  0xf1   :  { %v1724_v60 = vadd.f32 -1.0, %v489_v47  ;;  %v472_v55 = vsel %vm469_vm1, %v471_v45, %v467_v2 }
  0xf3   :  { %v492_v44 = vmul.f32 %v1724_v60, %v442_v40 }
  0xf5   :  { %v2524_v42 = vadd.f32 %v492_v44, %v491_v18 }
  0xf7   :  { %1782 = vtanh.f32 %v2524_v42 }
  0xfd   :  { %v1783_v63 = vpop.eup %1782 }
  0xfe   :  { %v495_v47 = vmul.f32 %v1783_v63, %v472_v55 }
 0x100   :  { %512 = vmatmul.f32.vlgmr.msra.gmra.mxu0 %v495_v47  ;;  %532 = vmatmul.f32.vlgmr.msra.gmra.mxu1 %v495_v47 }
 0x101   :  { %552 = vmatmul.f32.vlgmr.msra.gmra.mxu2 %v495_v47  ;;  %572 = vmatmul.f32.vlgmr.msra.gmra.mxu3 %v495_v47 }
 0x102   :  { %830 = vmatpush.msra.mxu0 %v2064_v7  ;;  %850 = vmatpush.msra.mxu1 %v2066_v8  ;;  %v3244_v7 = vld [vmem:[#allocation8_spill] sm:$0xff]  ;;  %v3245_v8 = vld [vmem:[#allocation6_spill] sm:$0xff] }
 0x103   :  { %870 = vmatpush.msra.mxu2 %v2074_v11  ;;  %890 = vmatpush.msra.mxu3 %v2060_v6  ;;  %v3243_v6 = vld [vmem:[#allocation7_spill] sm:$0xff]  ;;  %v3248_v11 = vld [vmem:[#allocation12_spill] sm:$0xff] }
 0x104   :  { %831 = vmatpush.msra.mxu0 %v2072_v10  ;;  %851 = vmatpush.msra.mxu1 %v2078_v12  ;;  %v3247_v10 = vld [vmem:[#allocation11_spill] sm:$0xff]  ;;  %v3249_v12 = vld [vmem:[#allocation9_spill] sm:$0xff] }
 0x105   :  { %871 = vmatpush.msra.mxu2 %v2086_v15  ;;  %891 = vmatpush.msra.mxu3 %v2070_v9  ;;  %v3246_v9 = vld [vmem:[#allocation10_spill] sm:$0xff]  ;;  %v3252_v15 = vld [vmem:[#allocation16_spill] sm:$0xff] }
 0x106   :  { %832 = vmatpush.msra.mxu0 %v2084_v14  ;;  %852 = vmatpush.msra.mxu1 %v2090_v16  ;;  %v3251_v14 = vld [vmem:[#allocation15_spill] sm:$0xff]  ;;  %v3253_v16 = vld [vmem:[#allocation13_spill] sm:$0xff] }
 0x107   :  { %872 = vmatpush.msra.mxu2 %v2092_v17  ;;  %892 = vmatpush.msra.mxu3 %v2080_v13  ;;  %v3250_v13 = vld [vmem:[#allocation14_spill] sm:$0xff] }
 0x108   :  { %833 = vmatpush.msra.mxu0 %v2104_v20  ;;  %853 = vmatpush.msra.mxu1 %v2109_v21  ;;  %v3254_v17 = vld [vmem:[#allocation18_spill] sm:$0xff]  ;;  %v3256_v20 = vld [vmem:[#allocation20_spill] sm:$0xff]  ;;  %v3257_v21 = vld [vmem:[#allocation17_spill] sm:$0xff] }
 0x109   :  { %873 = vmatpush.msra.mxu2 %v2111_v22  ;;  %893 = vmatpush.msra.mxu3 %v2101_v19  ;;  %v3255_v19 = vld [vmem:[#allocation19_spill] sm:$0xff]  ;;  %v3258_v22 = vld [vmem:[#allocation22_spill] sm:$0xff] }
 0x10a   :  { %834 = vmatpush.msra.mxu0 %v2117_v24  ;;  %854 = vmatpush.msra.mxu1 %v2121_v25  ;;  %v3260_v24 = vld [vmem:[#allocation24_spill] sm:$0xff]  ;;  %v3261_v25 = vld [vmem:[#allocation21_spill] sm:$0xff] }
 0x10b   :  { %874 = vmatpush.msra.mxu2 %v2123_v26  ;;  %894 = vmatpush.msra.mxu3 %v2115_v23  ;;  %v3259_v23 = vld [vmem:[#allocation23_spill] sm:$0xff]  ;;  %v3262_v26 = vld [vmem:[#allocation26_spill] sm:$0xff] }
 0x10c   :  { %835 = vmatpush.msra.mxu0 %v2129_v28  ;;  %855 = vmatpush.msra.mxu1 %v2133_v29  ;;  %v3264_v28 = vld [vmem:[#allocation28_spill] sm:$0xff]  ;;  %v3265_v29 = vld [vmem:[#allocation25_spill] sm:$0xff] }
 0x10d   :  { %875 = vmatpush.msra.mxu2 %v2135_v30  ;;  %895 = vmatpush.msra.mxu3 %v2125_v27  ;;  %v3263_v27 = vld [vmem:[#allocation27_spill] sm:$0xff]  ;;  %v3266_v30 = vld [vmem:[#allocation30_spill] sm:$0xff] }
 0x10e   :  { %836 = vmatpush.msra.mxu0 %v2147_v33  ;;  %856 = vmatpush.msra.mxu1 %v2152_v34  ;;  %v3268_v33 = vld [vmem:[#allocation32_spill] sm:$0xff]  ;;  %v3269_v34 = vld [vmem:[#allocation29_spill] sm:$0xff] }
 0x10f   :  { %876 = vmatpush.msra.mxu2 %v2154_v35  ;;  %896 = vmatpush.msra.mxu3 %v2144_v32  ;;  %v3267_v32 = vld [vmem:[#allocation31_spill] sm:$0xff]  ;;  %v3270_v35 = vld [vmem:[#allocation34_spill] sm:$0xff] }
 0x110   :  { %837 = vmatpush.msra.mxu0 %v2160_v37  ;;  %857 = vmatpush.msra.mxu1 %v2164_v38  ;;  %v3272_v37 = vld [vmem:[#allocation36_spill] sm:$0xff]  ;;  %v3273_v38 = vld [vmem:[#allocation33_spill] sm:$0xff] }
 0x111   :  { %877 = vmatpush.msra.mxu2 %v2166_v39  ;;  %897 = vmatpush.msra.mxu3 %v2158_v36  ;;  %v3271_v36 = vld [vmem:[#allocation35_spill] sm:$0xff] }
 0x112   :  { %838 = vmatpush.msra.mxu0 %v2172_v41  ;;  %858 = vmatpush.msra.mxu1 %v3243_v6  ;;  %v3274_v41 = vld [vmem:[#allocation37_spill] sm:$0xff] }
 0x113   :  { %878 = vmatpush.msra.mxu2 %v3244_v7  ;;  %898 = vmatpush.msra.mxu3 %v3245_v8 }
 0x114   :  { %839 = vmatpush.msra.mxu0 %v3246_v9  ;;  %859 = vmatpush.msra.mxu1 %v3247_v10 }
 0x115   :  { %879 = vmatpush.msra.mxu2 %v3248_v11  ;;  %899 = vmatpush.msra.mxu3 %v3249_v12 }
 0x116   :  { %840 = vmatpush.msra.mxu0 %v3250_v13  ;;  %860 = vmatpush.msra.mxu1 %v3251_v14 }
 0x117   :  { %880 = vmatpush.msra.mxu2 %v3252_v15  ;;  %900 = vmatpush.msra.mxu3 %v3253_v16 }
 0x118   :  { %841 = vmatpush.msra.mxu0 %v3254_v17  ;;  %861 = vmatpush.msra.mxu1 %v3255_v19  ;;  %v2713_v19 = vld [vmem:[#allocation3 + $0xc0] sm:$0xff] }
 0x119   :  { %881 = vmatpush.msra.mxu2 %v3256_v20  ;;  %901 = vmatpush.msra.mxu3 %v3257_v21  ;;  %3283 = vst [vmem:[#allocation10_spill] sm:$0xff] %v2713_v19 }
 0x11a   :  { %842 = vmatpush.msra.mxu0 %v3258_v22  ;;  %862 = vmatpush.msra.mxu1 %v3259_v23 }
 0x11b   :  { %882 = vmatpush.msra.mxu2 %v3260_v24  ;;  %902 = vmatpush.msra.mxu3 %v3261_v25 }
 0x11c   :  { %843 = vmatpush.msra.mxu0 %v3262_v26  ;;  %863 = vmatpush.msra.mxu1 %v3263_v27 }
 0x11d   :  { %883 = vmatpush.msra.mxu2 %v3264_v28  ;;  %903 = vmatpush.msra.mxu3 %v3265_v29 }
 0x11e   :  { %844 = vmatpush.msra.mxu0 %v3266_v30  ;;  %864 = vmatpush.msra.mxu1 %v3267_v32 }
 0x11f   :  { %884 = vmatpush.msra.mxu2 %v3268_v33  ;;  %904 = vmatpush.msra.mxu3 %v3269_v34 }
 0x120   :  { %845 = vmatpush.msra.mxu0 %v3270_v35  ;;  %865 = vmatpush.msra.mxu1 %v3271_v36 }
 0x121   :  { %885 = vmatpush.msra.mxu2 %v3272_v37  ;;  %905 = vmatpush.msra.mxu3 %v3273_v38 }
 0x17d   :  { %v513_v39 = vpop.f32.mrf.mxu0  ;;  %v533_v40 = vpop.f32.mrf.mxu1 }
 0x17e   :  { %v576_v43 = vadd.f32 %v513_v39, %v3274_v41  ;;  %v577_v48 = vadd.f32 %v533_v40, %v3275_v46 }
 0x180   :  { %v1725_v50 = vmul.f32 -1.442695, %v576_v43  ;;  %v1726_v1 = vmul.f32 -1.442695, %v577_v48 }
 0x182   :  { %1784 = vpow2.f32 %v1725_v50 }
 0x183   :  { %1786 = vpow2.f32 %v1726_v1 }
 0x184   :  { %v553_v57 = vpop.f32.mrf.mxu2  ;;  %v573_v51 = vpop.f32.mrf.mxu3 }
 0x185   :  { %v578_v31 = vadd.f32 %v553_v57, %v3276_v62  ;;  %v579_v61 = vadd.f32 %v573_v51, %v3277_v53  ;;  %v2608_v51 = vld [vmem:[#allocation3 + $0x1e8] sm:$0xff]  ;;  %v2611_v62 = vld [vmem:[#allocation3 + $0x1f0] sm:$0xff]  ;;  %v2617_v53 = vld [vmem:[#allocation3 + $0x1c0] sm:$0xff] }
 0x187   :  { %v1727_v58 = vmul.f32 -1.442695, %v578_v31  ;;  %v1728_v0 = vmul.f32 -1.442695, %v579_v61  ;;  %v2614_v31 = vld [vmem:[#allocation3 + $0x1f8] sm:$0xff]  ;;  %v2620_v61 = vld [vmem:[#allocation3 + $0x1c8] sm:$0xff] }
 0x188   :  { %v1785_v54 = vpop.eup %1784 }
 0x189   :  { %v1787_v4 = vpop.eup %1786  ;;  %v592_v56 = vadd.f32 1.0, %v1785_v54  ;;  %1788 = vpow2.f32 %v1727_v58  ;;  %v2623_v58 = vld [vmem:[#allocation3 + $0x1d0] sm:$0xff]  ;;  %v2629_v54 = vld [vmem:[#allocation3 + $0x1a0] sm:$0xff] }
 0x18a   :  { %v593_v3 = vadd.f32 1.0, %v1787_v4  ;;  %1790 = vpow2.f32 %v1728_v0  ;;  %v2626_v0 = vld [vmem:[#allocation3 + $0x1d8] sm:$0xff]  ;;  %v2632_v4 = vld [vmem:[#allocation3 + $0x1a8] sm:$0xff] }
 0x18b   :  { %1792 = vrcp.f32 %v592_v56  ;;  %vm601_vm8 = vweird.f32 %v592_v56  ;;  %v607_v21 = vand.u32 2147483648, %v592_v56  ;;  %v605_v23 = vand.u32 2147483647, %v592_v56 }
 0x18c   :  { %1794 = vrcp.f32 %v593_v3  ;;  %vm616_vm4 = vweird.f32 %v593_v3  ;;  %v620_v14 = vand.u32 2147483647, %v593_v3  ;;  %v622_v15 = vand.u32 2147483648, %v593_v3 }
 0x18d   :  { %v608_v32 = vor.u32 1.1754944e-38, %v607_v21  ;;  %vm606_vm13 = vcmp.eq.f32.partialorder %v605_v23, 8.507059e+37  ;;  %v2719_v21 = vld [vmem:[#allocation3 + $0xd0] sm:$0xff]  ;;  %v2725_v23 = vld [vmem:[#allocation3 + $0xa0] sm:$0xff] }
 0x18e   :  { %v623_v26 = vor.u32 1.1754944e-38, %v622_v15  ;;  %vm621_vm12 = vcmp.eq.f32.partialorder %v620_v14, 8.507059e+37  ;;  %v2701_v14 = vld [vmem:[#allocation3 + $0xe0] sm:$0xff]  ;;  %v2704_v15 = vld [vmem:[#allocation3 + $0xe8] sm:$0xff]  ;;  %3285 = vst [vmem:[#allocation12_spill] sm:$0xff] %v2719_v21 }
 0x18f   :  { %v1789_v49 = vpop.eup %1788  ;;  %3280 = vst [vmem:[#allocation7_spill] sm:$0xff] %v2704_v15 }
 0x190   :  { %v1791_v60 = vpop.eup %1790  ;;  %v594_v52 = vadd.f32 1.0, %v1789_v49  ;;  %v2641_v49 = vld [vmem:[#allocation3 + $0x180] sm:$0xff]  ;;  %3287 = vst [vmem:[#allocation14_spill] sm:$0xff] %v2725_v23 }
 0x191   :  { %v1793_v18 = vpop.eup %1792  ;;  %v595_v44 = vadd.f32 1.0, %v1791_v60  ;;  %v2644_v60 = vld [vmem:[#allocation3 + $0x188] sm:$0xff] }
 0x192   :  { %v1795_v5 = vpop.eup %1794  ;;  %v597_v2 = vmul.f32 %v1793_v18, %v592_v56  ;;  %vm602_vm5 = vweird.f32 %v1793_v18  ;;  %v637_v41 = vand.u32 2147483648, %v594_v52  ;;  %vm631_vm15 = vweird.f32 %v594_v52  ;;  %v2635_v56 = vld [vmem:[#allocation3 + $0x1b0] sm:$0xff] }
 0x193   :  { %v612_v59 = vmul.f32 %v1795_v5, %v593_v3  ;;  %1796 = vrcp.f32 %v595_v44  ;;  %vm617_vm2 = vweird.f32 %v1795_v5  ;;  %v652_v10 = vand.u32 2147483648, %v595_v44  ;;  %vm603_vm11 = vmor %vm601_vm8, %vm602_vm5  ;;  %v2638_v3 = vld [vmem:[#allocation3 + $0x1b8] sm:$0xff] }
 0x194   :  { %1798 = vrcp.f32 %v594_v52  ;;  %v598_v63 = vsub.f32 1.0, %v597_v2  ;;  %v650_v13 = vand.u32 2147483647, %v595_v44  ;;  %vm2595_vm6 = vmor %vm616_vm4, %vm617_vm2  ;;  %vm646_vm7 = vweird.f32 %v595_v44  ;;  %v2662_v2 = vld [vmem:[#allocation3 + $0x178] sm:$0xff] }
 0x195   :  { %v613_v45 = vsub.f32 1.0, %v612_v59  ;;  %v653_v22 = vor.u32 1.1754944e-38, %v652_v10  ;;  %v635_v43 = vand.u32 2147483647, %v594_v52  ;;  %v638_v48 = vor.u32 1.1754944e-38, %v637_v41  ;;  %v2659_v59 = vld [vmem:[#allocation3 + $0x170] sm:$0xff] }
 0x196   :  { %v599_v8 = vmul.f32 %v1793_v18, %v598_v63  ;;  %vm651_vm10 = vcmp.eq.f32.partialorder %v650_v13, 8.507059e+37  ;;  %v2668_v63 = vld [vmem:[#allocation3 + $0x148] sm:$0xff]  ;;  %v2689_v10 = vld [vmem:[#allocation3 + $0x100] sm:$0xff]  ;;  %v2698_v13 = vld [vmem:[#allocation3 + $0x118] sm:$0xff] }
 0x197   :  { %v614_v47 = vmul.f32 %v1795_v5, %v613_v45  ;;  %vm636_vm1 = vcmp.eq.f32.partialorder %v635_v43, 8.507059e+37  ;;  %v2665_v45 = vld [vmem:[#allocation3 + $0x140] sm:$0xff]  ;;  %v2776_v43 = vld [vmem:[#allocation3 + $0x28] sm:$0xff] }
 0x198   :  { %v600_v17 = vadd.f32 %v1793_v18, %v599_v8  ;;  %v2683_v8 = vld [vmem:[#allocation3 + $0x130] sm:$0xff]  ;;  %v2773_v41 = vld [vmem:[#allocation3 + $0x20] sm:$0xff]  ;;  %3304 = vst [vmem:[#allocation31_spill] sm:$0xff] %v2776_v43 }
 0x199   :  { %v1797_v55 = vpop.eup %1796  ;;  %v615_v11 = vadd.f32 %v1795_v5, %v614_v47  ;;  %v2674_v47 = vld [vmem:[#allocation3 + $0x158] sm:$0xff]  ;;  %3303 = vst [vmem:[#allocation30_spill] sm:$0xff] %v2773_v41 }
 0x19a   :  { %v642_v6 = vmul.f32 %v1797_v55, %v595_v44  ;;  %v1799_v7 = vpop.eup %1798  ;;  %vm647_vm3 = vweird.f32 %v1797_v55  ;;  %v604_v29 = vsel %vm603_vm11, %v1793_v18, %v600_v17  ;;  %v2647_v18 = vld [vmem:[#allocation3 + $0x190] sm:$0xff]  ;;  %v2650_v44 = vld [vmem:[#allocation3 + $0x198] sm:$0xff] }
 0x19b   :  { %v627_v16 = vmul.f32 %v1799_v7, %v594_v52  ;;  %vm648_vm9 = vmor %vm646_vm7, %vm647_vm3  ;;  %v619_v24 = vsel %vm2595_vm6, %v1795_v5, %v615_v11  ;;  %v609_v35 = vsel %vm606_vm13, %v608_v32, %v604_v29  ;;  %vm632_vm14 = vweird.f32 %v1799_v7  ;;  %v2653_v5 = vld [vmem:[#allocation3 + $0x160] sm:$0xff]  ;;  %v2656_v52 = vld [vmem:[#allocation3 + $0x168] sm:$0xff] }
 0x19c   :  { %v643_v9 = vsub.f32 1.0, %v642_v6  ;;  %v624_v33 = vsel %vm621_vm12, %v623_v26, %v619_v24  ;;  %vm633_vm0 = vmor %vm631_vm15, %vm632_vm14  ;;  %v2677_v6 = vld [vmem:[#allocation3 + $0x120] sm:$0xff]  ;;  %v2692_v11 = vld [vmem:[#allocation3 + $0x108] sm:$0xff] }
 0x19d   :  { %v628_v27 = vsub.f32 1.0, %v627_v16  ;;  %v658_v37 = vmul.f32 %v624_v33, %v2524_v42  ;;  %v2605_v42 = vld [vmem:[#allocation3 + $0x1e0] sm:$0xff]  ;;  %v2707_v16 = vld [vmem:[#allocation3 + $0xf0] sm:$0xff]  ;;  %v2710_v17 = vld [vmem:[#allocation3 + $0xf8] sm:$0xff] }
 0x19e   :  { %v644_v12 = vmul.f32 %v1797_v55, %v643_v9  ;;  %v2686_v9 = vld [vmem:[#allocation3 + $0x138] sm:$0xff]  ;;  %3281 = vst [vmem:[#allocation8_spill] sm:$0xff] %v2707_v16  ;;  %v2728_v24 = vld [vmem:[#allocation3 + $0xa8] sm:$0xff]  ;;  %v2743_v29 = vld [vmem:[#allocation3 + $0x90] sm:$0xff] }
 0x19f   :  { %v629_v36 = vmul.f32 %v1799_v7, %v628_v27  ;;  %3282 = vst [vmem:[#allocation6_spill] sm:$0xff] %v2710_v17  ;;  %v2734_v26 = vld [vmem:[#allocation3 + $0xb8] sm:$0xff]  ;;  %v2737_v27 = vld [vmem:[#allocation3 + $0x80] sm:$0xff]  ;;  %v2752_v33 = vld [vmem:[#allocation3 + $0x68] sm:$0xff] }
 0x1a0   :  { %v645_v20 = vadd.f32 %v1797_v55, %v644_v12  ;;  %v2695_v12 = vld [vmem:[#allocation3 + $0x110] sm:$0xff]  ;;  %3288 = vst [vmem:[#allocation15_spill] sm:$0xff] %v2728_v24  ;;  %v2749_v32 = vld [vmem:[#allocation3 + $0x60] sm:$0xff] }
 0x1a1   :  { %v630_v40 = vadd.f32 %v1799_v7, %v629_v36  ;;  %3290 = vst [vmem:[#allocation13_spill] sm:$0xff] %v2734_v26  ;;  %v2761_v36 = vld [vmem:[#allocation3 + $0x40] sm:$0xff] }
 0x1a2   :  { %v649_v25 = vsel %vm648_vm9, %v1797_v55, %v645_v20  ;;  %v2671_v55 = vld [vmem:[#allocation3 + $0x150] sm:$0xff]  ;;  %v2716_v20 = vld [vmem:[#allocation3 + $0xc8] sm:$0xff]  ;;  %3291 = vst [vmem:[#allocation18_spill] sm:$0xff] %v2737_v27 }
 0x1a3   :  { %v654_v28 = vsel %vm651_vm10, %v653_v22, %v649_v25  ;;  %v634_v46 = vsel %vm633_vm0, %v1799_v7, %v630_v40  ;;  %v2680_v7 = vld [vmem:[#allocation3 + $0x128] sm:$0xff]  ;;  %3284 = vst [vmem:[#allocation11_spill] sm:$0xff] %v2716_v20  ;;  %v2722_v22 = vld [vmem:[#allocation3 + $0xd8] sm:$0xff]  ;;  %v2731_v25 = vld [vmem:[#allocation3 + $0xb0] sm:$0xff] }
 0x1a4   :  { %v656_v30 = vmul.f32 2.0, %v654_v28  ;;  %v639_v1 = vsel %vm636_vm1, %v638_v48, %v634_v46  ;;  %3286 = vst [vmem:[#allocation9_spill] sm:$0xff] %v2722_v22  ;;  %v2740_v28 = vld [vmem:[#allocation3 + $0x88] sm:$0xff]  ;;  %v2770_v40 = vld [vmem:[#allocation3 + $0x58] sm:$0xff]  ;;  %v2779_v46 = vld [vmem:[#allocation3 + $0x30] sm:$0xff] }
 0x1a5   :  { %3289 = vst [vmem:[#allocation16_spill] sm:$0xff] %v2731_v25  ;;  %v2782_v48 = vld [vmem:[#allocation3 + $0x38] sm:$0xff] }
 0x1a6   :  { %v1729_v34 = vadd.f32 -1.0, %v656_v30  ;;  %3292 = vst [vmem:[#allocation19_spill] sm:$0xff] %v2740_v28  ;;  %v2746_v30 = vld [vmem:[#allocation3 + $0x98] sm:$0xff] }
 0x1a7   :  { %3293 = vst [vmem:[#allocation20_spill] sm:$0xff] %v2743_v29 }
 0x1a8   :  { %v659_v38 = vmul.f32 %v1729_v34, %v609_v35  ;;  %3294 = vst [vmem:[#allocation17_spill] sm:$0xff] %v2746_v30  ;;  %v2755_v34 = vld [vmem:[#allocation3 + $0x70] sm:$0xff]  ;;  %v2758_v35 = vld [vmem:[#allocation3 + $0x78] sm:$0xff] }
 0x1a9   :  { %3295 = vst [vmem:[#allocation22_spill] sm:$0xff] %v2749_v32 }
 0x1aa   :  { %v2602_v39 = vadd.f32 %v659_v38, %v658_v37  ;;  %3296 = vst [vmem:[#allocation23_spill] sm:$0xff] %v2752_v33  ;;  %v2764_v37 = vld [vmem:[#allocation3 + $0x48] sm:$0xff]  ;;  %v2767_v38 = vld [vmem:[#allocation3 + $0x50] sm:$0xff] }
 0x1ab   :  { %3297 = vst [vmem:[#allocation24_spill] sm:$0xff] %v2755_v34 }
 0x1ac   :  { %1800 = vtanh.f32 %v2602_v39  ;;  %3298 = vst [vmem:[#allocation21_spill] sm:$0xff] %v2758_v35 }
 0x1ad   :  { %3299 = vst [vmem:[#allocation26_spill] sm:$0xff] %v2761_v36 }
 0x1ae   :  { %3300 = vst [vmem:[#allocation27_spill] sm:$0xff] %v2764_v37 }
 0x1af   :  { %3301 = vst [vmem:[#allocation28_spill] sm:$0xff] %v2767_v38 }
 0x1b0   :  { %3302 = vst [vmem:[#allocation25_spill] sm:$0xff] %v2770_v40 }
 0x1b1   :  { %3305 = vst [vmem:[#allocation32_spill] sm:$0xff] %v2779_v46 }
 0x1b2   :  { %v1801_v50 = vpop.eup %1800  ;;  %3306 = vst [vmem:[#allocation29_spill] sm:$0xff] %v2782_v48 }
 0x1b3   :  { %v662_v57 = vmul.f32 %v1801_v50, %v639_v1  ;;  %v2785_v50 = vld [vmem:[#allocation3] sm:$0xff]  ;;  %v2788_v1 = vld [vmem:[#allocation3 + $0x8] sm:$0xff] }
 0x1b4   :  { %3307 = vst [vmem:[#allocation34_spill] sm:$0xff] %v2785_v50 }
 0x1b5   :  { %679 = vmatmul.f32.vlgmr.msrb.gmra.mxu0 %v662_v57  ;;  %699 = vmatmul.f32.vlgmr.msrb.gmra.mxu1 %v662_v57  ;;  %3308 = vst [vmem:[#allocation35_spill] sm:$0xff] %v2788_v1 }
 0x1b6   :  { %719 = vmatmul.f32.vlgmr.msrb.gmra.mxu2 %v662_v57  ;;  %739 = vmatmul.f32.vlgmr.msrb.gmra.mxu3 %v662_v57  ;;  %v2791_v57 = vld [vmem:[#allocation3 + $0x10] sm:$0xff] }
 0x1b7   :  { %997 = vmatpush.msrb.mxu0 %v2605_v42  ;;  %1017 = vmatpush.msrb.mxu1 %v2608_v51  ;;  %3309 = vst [vmem:[#allocation36_spill] sm:$0xff] %v2791_v57 }
 0x1b8   :  { %1037 = vmatpush.msrb.mxu2 %v2611_v62  ;;  %1057 = vmatpush.msrb.mxu3 %v2614_v31 }
 0x1b9   :  { %998 = vmatpush.msrb.mxu0 %v2617_v53  ;;  %1018 = vmatpush.msrb.mxu1 %v2620_v61 }
 0x1ba   :  { %1038 = vmatpush.msrb.mxu2 %v2623_v58  ;;  %1058 = vmatpush.msrb.mxu3 %v2626_v0 }
 0x1bb   :  { %999 = vmatpush.msrb.mxu0 %v2629_v54  ;;  %1019 = vmatpush.msrb.mxu1 %v2632_v4 }
 0x1bc   :  { %1039 = vmatpush.msrb.mxu2 %v2635_v56  ;;  %1059 = vmatpush.msrb.mxu3 %v2638_v3 }
 0x1bd   :  { %1000 = vmatpush.msrb.mxu0 %v2641_v49  ;;  %1020 = vmatpush.msrb.mxu1 %v2644_v60 }
 0x1be   :  { %1040 = vmatpush.msrb.mxu2 %v2647_v18  ;;  %1060 = vmatpush.msrb.mxu3 %v2650_v44 }
 0x1bf   :  { %1001 = vmatpush.msrb.mxu0 %v2653_v5  ;;  %1021 = vmatpush.msrb.mxu1 %v2656_v52 }
 0x1c0   :  { %1041 = vmatpush.msrb.mxu2 %v2659_v59  ;;  %1061 = vmatpush.msrb.mxu3 %v2662_v2 }
 0x1c1   :  { %1002 = vmatpush.msrb.mxu0 %v2665_v45  ;;  %1022 = vmatpush.msrb.mxu1 %v2668_v63 }
 0x1c2   :  { %1042 = vmatpush.msrb.mxu2 %v2671_v55  ;;  %1062 = vmatpush.msrb.mxu3 %v2674_v47 }
 0x1c3   :  { %1003 = vmatpush.msrb.mxu0 %v2677_v6  ;;  %1023 = vmatpush.msrb.mxu1 %v2680_v7 }
 0x1c4   :  { %1043 = vmatpush.msrb.mxu2 %v2683_v8  ;;  %1063 = vmatpush.msrb.mxu3 %v2686_v9 }
 0x1c5   :  { %1004 = vmatpush.msrb.mxu0 %v2689_v10  ;;  %1024 = vmatpush.msrb.mxu1 %v2692_v11 }
 0x1c6   :  { %1044 = vmatpush.msrb.mxu2 %v2695_v12  ;;  %1064 = vmatpush.msrb.mxu3 %v2698_v13 }
 0x1c7   :  { %1005 = vmatpush.msrb.mxu0 %v2701_v14  ;;  %1025 = vmatpush.msrb.mxu1 %v2704_v15 }
 0x1c8   :  { %1045 = vmatpush.msrb.mxu2 %v2707_v16  ;;  %1065 = vmatpush.msrb.mxu3 %v2710_v17 }
 0x1c9   :  { %1006 = vmatpush.msrb.mxu0 %v2713_v19  ;;  %1026 = vmatpush.msrb.mxu1 %v2716_v20 }
 0x1ca   :  { %1046 = vmatpush.msrb.mxu2 %v2719_v21  ;;  %1066 = vmatpush.msrb.mxu3 %v2722_v22 }
 0x1cb   :  { %1007 = vmatpush.msrb.mxu0 %v2725_v23  ;;  %1027 = vmatpush.msrb.mxu1 %v2728_v24 }
 0x1cc   :  { %1047 = vmatpush.msrb.mxu2 %v2731_v25  ;;  %1067 = vmatpush.msrb.mxu3 %v2734_v26 }
 0x1cd   :  { %1008 = vmatpush.msrb.mxu0 %v2737_v27  ;;  %1028 = vmatpush.msrb.mxu1 %v2740_v28 }
 0x1ce   :  { %1048 = vmatpush.msrb.mxu2 %v2743_v29  ;;  %1068 = vmatpush.msrb.mxu3 %v2746_v30 }
 0x1cf   :  { %1009 = vmatpush.msrb.mxu0 %v2749_v32  ;;  %1029 = vmatpush.msrb.mxu1 %v2752_v33  ;;  %v3314_v32 = vld [vmem:[#allocation44_spill] sm:$0xff] }
 0x1d0   :  { %1049 = vmatpush.msrb.mxu2 %v2755_v34  ;;  %1069 = vmatpush.msrb.mxu3 %v2758_v35  ;;  %v3313_v34 = vld [vmem:[#allocation43_spill] sm:$0xff] }
 0x1d1   :  { %1010 = vmatpush.msrb.mxu0 %v2761_v36  ;;  %1030 = vmatpush.msrb.mxu1 %v2764_v37 }
 0x1d2   :  { %1050 = vmatpush.msrb.mxu2 %v2767_v38  ;;  %1070 = vmatpush.msrb.mxu3 %v2770_v40  ;;  %v3311_v40 = vld [vmem:[#allocation41_spill] sm:$0xff]  ;;  %v3312_v38 = vld [vmem:[#allocation42_spill] sm:$0xff] }
 0x1d3   :  { %1011 = vmatpush.msrb.mxu0 %v2773_v41  ;;  %1031 = vmatpush.msrb.mxu1 %v2776_v43  ;;  %v2794_v43 = vld [vmem:[#allocation3 + $0x18] sm:$0xff] }
 0x1d4   :  { %1051 = vmatpush.msrb.mxu2 %v2779_v46  ;;  %1071 = vmatpush.msrb.mxu3 %v2782_v48  ;;  %3310 = vst [vmem:[#allocation33_spill] sm:$0xff] %v2794_v43 }
 0x1d5   :  { %1012 = vmatpush.msrb.mxu0 %v2785_v50  ;;  %1032 = vmatpush.msrb.mxu1 %v2788_v1 }
 0x1d6   :  { %1052 = vmatpush.msrb.mxu2 %v2791_v57  ;;  %1072 = vmatpush.msrb.mxu3 %v2794_v43 }
 0x232   :  { %v680_v46 = vpop.f32.mrf.mxu0  ;;  %v700_v41 = vpop.f32.mrf.mxu1 }
 0x233   :  { %v743_v48 = vadd.f32 %v680_v46, %v3311_v40  ;;  %v744_v37 = vadd.f32 %v700_v41, %v3312_v38 }
 0x235   :  { %v1730_v36 = vmul.f32 -1.442695, %v743_v48  ;;  %v1731_v50 = vmul.f32 -1.442695, %v744_v37 }
 0x237   :  { %1802 = vpow2.f32 %v1730_v36 }
 0x238   :  { %1804 = vpow2.f32 %v1731_v50 }
 0x239   :  { %v720_v35 = vpop.f32.mrf.mxu2  ;;  %v740_v1 = vpop.f32.mrf.mxu3 }
 0x23a   :  { %v745_v33 = vadd.f32 %v720_v35, %v3313_v34  ;;  %v746_v57 = vadd.f32 %v740_v1, %v3314_v32 }
 0x23c   :  { %v1732_v30 = vmul.f32 -1.442695, %v745_v33  ;;  %v1733_v29 = vmul.f32 -1.442695, %v746_v57 }
 0x23d   :  { %v1803_v28 = vpop.eup %1802 }
 0x23e   :  { %v1805_v43 = vpop.eup %1804  ;;  %v759_v27 = vadd.f32 1.0, %v1803_v28  ;;  %1806 = vpow2.f32 %v1732_v30 }
 0x23f   :  { %v760_v26 = vadd.f32 1.0, %v1805_v43  ;;  %1808 = vpow2.f32 %v1733_v29 }
 0x240   :  { %1810 = vrcp.f32 %v759_v27  ;;  %vm768_vm8 = vweird.f32 %v759_v27 }
 0x241   :  { %1812 = vrcp.f32 %v760_v26  ;;  %vm783_vm4 = vweird.f32 %v760_v26  ;;  %v789_v24 = vand.u32 2147483648, %v760_v26 }
 0x244   :  { %v1807_v38 = vpop.eup %1806 }
 0x245   :  { %v1809_v37 = vpop.eup %1808  ;;  %v761_v46 = vadd.f32 1.0, %v1807_v38  ;;  %v787_v38 = vand.u32 2147483647, %v760_v26 }
 0x246   :  { %v1811_v36 = vpop.eup %1810  ;;  %v762_v40 = vadd.f32 1.0, %v1809_v37 }
 0x247   :  { %v1813_v41 = vpop.eup %1812  ;;  %v764_v34 = vmul.f32 %v1811_v36, %v759_v27  ;;  %vm769_vm5 = vweird.f32 %v1811_v36  ;;  %vm788_vm12 = vcmp.eq.f32.partialorder %v787_v38, 8.507059e+37  ;;  %vm798_vm15 = vweird.f32 %v761_v46  ;;  %v3326_v38 = vld [vmem:[#allocation16_spill] sm:$0xff] }
 0x248   :  { %v779_v48 = vmul.f32 %v1813_v41, %v760_v26  ;;  %1814 = vrcp.f32 %v762_v40  ;;  %vm784_vm2 = vweird.f32 %v1813_v41  ;;  %v819_v1 = vand.u32 2147483648, %v762_v40  ;;  %vm770_vm11 = vmor %vm768_vm8, %vm769_vm5 }
 0x249   :  { %1816 = vrcp.f32 %v761_v46  ;;  %v765_v33 = vsub.f32 1.0, %v764_v34  ;;  %v817_v37 = vand.u32 2147483647, %v762_v40  ;;  %vm2801_vm6 = vmor %vm783_vm4, %vm784_vm2  ;;  %vm813_vm7 = vweird.f32 %v762_v40 }
 0x24a   :  { %v780_v32 = vsub.f32 1.0, %v779_v48  ;;  %v790_v26 = vor.u32 1.1754944e-38, %v789_v24 }
 0x24b   :  { %v766_v43 = vmul.f32 %v1811_v36, %v765_v33  ;;  %v820_v33 = vor.u32 1.1754944e-38, %v819_v1  ;;  %vm818_vm10 = vcmp.eq.f32.partialorder %v817_v37, 8.507059e+37  ;;  %v3325_v37 = vld [vmem:[#allocation15_spill] sm:$0xff] }
 0x24c   :  { %v781_v50 = vmul.f32 %v1813_v41, %v780_v32  ;;  %v774_v32 = vand.u32 2147483648, %v759_v27 }
 0x24d   :  { %v767_v22 = vadd.f32 %v1811_v36, %v766_v43 }
 0x24e   :  { %v1815_v35 = vpop.eup %1814  ;;  %v782_v57 = vadd.f32 %v1813_v41, %v781_v50  ;;  %v772_v50 = vand.u32 2147483647, %v759_v27  ;;  %v775_v17 = vor.u32 1.1754944e-38, %v774_v32  ;;  %v3328_v32 = vld [vmem:[#allocation18_spill] sm:$0xff] }
 0x24f   :  { %v809_v28 = vmul.f32 %v1815_v35, %v762_v40  ;;  %v1817_v30 = vpop.eup %1816  ;;  %vm814_vm3 = vweird.f32 %v1815_v35  ;;  %v771_v20 = vsel %vm770_vm11, %v1811_v36, %v767_v22  ;;  %v802_v22 = vand.u32 2147483647, %v761_v46  ;;  %v3321_v36 = vld [vmem:[#allocation11_spill] sm:$0xff] }
 0x250   :  { %v794_v23 = vmul.f32 %v1817_v30, %v761_v46  ;;  %vm815_vm9 = vmor %vm813_vm7, %vm814_vm3  ;;  %vm773_vm13 = vcmp.eq.f32.partialorder %v772_v50, 8.507059e+37  ;;  %vm799_vm14 = vweird.f32 %v1817_v30  ;;  %v3330_v50 = vld [vmem:[#allocation20_spill] sm:$0xff] }
 0x251   :  { %v810_v29 = vsub.f32 1.0, %v809_v28  ;;  %v786_v28 = vsel %vm2801_vm6, %v1813_v41, %v782_v57  ;;  %v776_v16 = vsel %vm773_vm13, %v775_v17, %v771_v20  ;;  %vm800_vm0 = vmor %vm798_vm15, %vm799_vm14  ;;  %vm803_vm1 = vcmp.eq.f32.partialorder %v802_v22, 8.507059e+37  ;;  %v3320_v20 = vld [vmem:[#allocation10_spill] sm:$0xff]  ;;  %v3341_v22 = vld [vmem:[#allocation31_spill] sm:$0xff] }
 0x252   :  { %v795_v43 = vsub.f32 1.0, %v794_v23  ;;  %v3324_v57 = vld [vmem:[#allocation14_spill] sm:$0xff] }
 0x253   :  { %v811_v25 = vmul.f32 %v1815_v35, %v810_v29 }
 0x254   :  { %v796_v15 = vmul.f32 %v1817_v30, %v795_v43  ;;  %v3334_v43 = vld [vmem:[#allocation24_spill] sm:$0xff] }
 0x255   :  { %v812_v34 = vadd.f32 %v1815_v35, %v811_v25  ;;  %v791_v25 = vsel %vm788_vm12, %v790_v26, %v786_v28  ;;  %v3331_v28 = vld [vmem:[#allocation17_spill] sm:$0xff]  ;;  %v3333_v26 = vld [vmem:[#allocation23_spill] sm:$0xff] }
 0x256   :  { %v825_v27 = vmul.f32 %v791_v25, %v2602_v39  ;;  %v797_v41 = vadd.f32 %v1817_v30, %v796_v15  ;;  %v3317_v39 = vld [vmem:[#allocation7_spill] sm:$0xff]  ;;  %v3318_v15 = vld [vmem:[#allocation8_spill] sm:$0xff]  ;;  %v3335_v25 = vld [vmem:[#allocation21_spill] sm:$0xff] }
 0x257   :  { %v816_v29 = vsel %vm815_vm9, %v1815_v35, %v812_v34  ;;  %v804_v35 = vand.u32 2147483648, %v761_v46  ;;  %v3322_v46 = vld [vmem:[#allocation12_spill] sm:$0xff]  ;;  %v3327_v34 = vld [vmem:[#allocation13_spill] sm:$0xff] }
 0x258   :  { %v821_v21 = vsel %vm818_vm10, %v820_v33, %v816_v29  ;;  %v3329_v33 = vld [vmem:[#allocation19_spill] sm:$0xff]  ;;  %v3332_v29 = vld [vmem:[#allocation22_spill] sm:$0xff] }
 0x259   :  { %v823_v19 = vmul.f32 2.0, %v821_v21  ;;  %v801_v21 = vsel %vm800_vm0, %v1817_v30, %v797_v41  ;;  %v805_v23 = vor.u32 1.1754944e-38, %v804_v35  ;;  %v3323_v30 = vld [vmem:[#allocation9_spill] sm:$0xff]  ;;  %v3340_v35 = vld [vmem:[#allocation30_spill] sm:$0xff] }
 0x25a   :  { %v3339_v41 = vld [vmem:[#allocation25_spill] sm:$0xff] }
 0x25b   :  { %v1734_v40 = vadd.f32 -1.0, %v823_v19  ;;  %v806_v19 = vsel %vm803_vm1, %v805_v23, %v801_v21  ;;  %v3342_v21 = vld [vmem:[#allocation32_spill] sm:$0xff]  ;;  %v3343_v23 = vld [vmem:[#allocation29_spill] sm:$0xff] }
 0x25d   :  { %v826_v1 = vmul.f32 %v1734_v40, %v776_v16  ;;  %v3319_v16 = vld [vmem:[#allocation6_spill] sm:$0xff] }
 0x25e   :  { %v3336_v40 = vld [vmem:[#allocation26_spill] sm:$0xff] }
 0x25f   :  { %v2808_v48 = vadd.f32 %v826_v1, %v825_v27  ;;  %v3337_v27 = vld [vmem:[#allocation27_spill] sm:$0xff]  ;;  %v3338_v1 = vld [vmem:[#allocation28_spill] sm:$0xff] }
 0x261   :  { %1818 = vtanh.f32 %v2808_v48 }
 0x267   :  { %v1819_v24 = vpop.eup %1818 }
 0x268   :  { %v829_v17 = vmul.f32 %v1819_v24, %v806_v19  ;;  %v3344_v24 = vld [vmem:[#allocation34_spill] sm:$0xff]  ;;  %v3345_v19 = vld [vmem:[#allocation35_spill] sm:$0xff] }
 0x26a   :  { %846 = vmatmul.f32.vlgmr.msra.gmra.mxu0 %v829_v17  ;;  %866 = vmatmul.f32.vlgmr.msra.gmra.mxu1 %v829_v17 }
 0x26b   :  { %886 = vmatmul.f32.vlgmr.msra.gmra.mxu2 %v829_v17  ;;  %906 = vmatmul.f32.vlgmr.msra.gmra.mxu3 %v829_v17  ;;  %v3346_v17 = vld [vmem:[#allocation36_spill] sm:$0xff] }
 0x26c   :  { %1164 = vmatpush.msra.mxu0 %v2605_v42  ;;  %1184 = vmatpush.msra.mxu1 %v2608_v51 }
 0x26d   :  { %1204 = vmatpush.msra.mxu2 %v2611_v62  ;;  %1224 = vmatpush.msra.mxu3 %v2614_v31 }
 0x26e   :  { %1165 = vmatpush.msra.mxu0 %v2617_v53  ;;  %1185 = vmatpush.msra.mxu1 %v2620_v61 }
 0x26f   :  { %1205 = vmatpush.msra.mxu2 %v2623_v58  ;;  %1225 = vmatpush.msra.mxu3 %v2626_v0 }
 0x270   :  { %1166 = vmatpush.msra.mxu0 %v2629_v54  ;;  %1186 = vmatpush.msra.mxu1 %v2632_v4 }
 0x271   :  { %1206 = vmatpush.msra.mxu2 %v2635_v56  ;;  %1226 = vmatpush.msra.mxu3 %v2638_v3 }
 0x272   :  { %1167 = vmatpush.msra.mxu0 %v2641_v49  ;;  %1187 = vmatpush.msra.mxu1 %v2644_v60 }
 0x273   :  { %1207 = vmatpush.msra.mxu2 %v2647_v18  ;;  %1227 = vmatpush.msra.mxu3 %v2650_v44 }
 0x274   :  { %1168 = vmatpush.msra.mxu0 %v2653_v5  ;;  %1188 = vmatpush.msra.mxu1 %v2656_v52 }
 0x275   :  { %1208 = vmatpush.msra.mxu2 %v2659_v59  ;;  %1228 = vmatpush.msra.mxu3 %v2662_v2 }
 0x276   :  { %1169 = vmatpush.msra.mxu0 %v2665_v45  ;;  %1189 = vmatpush.msra.mxu1 %v2668_v63 }
 0x277   :  { %1209 = vmatpush.msra.mxu2 %v2671_v55  ;;  %1229 = vmatpush.msra.mxu3 %v2674_v47 }
 0x278   :  { %1170 = vmatpush.msra.mxu0 %v2677_v6  ;;  %1190 = vmatpush.msra.mxu1 %v2680_v7 }
 0x279   :  { %1210 = vmatpush.msra.mxu2 %v2683_v8  ;;  %1230 = vmatpush.msra.mxu3 %v2686_v9 }
 0x27a   :  { %1171 = vmatpush.msra.mxu0 %v2689_v10  ;;  %1191 = vmatpush.msra.mxu1 %v2692_v11 }
 0x27b   :  { %1211 = vmatpush.msra.mxu2 %v2695_v12  ;;  %1231 = vmatpush.msra.mxu3 %v2698_v13 }
 0x27c   :  { %1172 = vmatpush.msra.mxu0 %v2701_v14  ;;  %1192 = vmatpush.msra.mxu1 %v3317_v39 }
 0x27d   :  { %1212 = vmatpush.msra.mxu2 %v3318_v15  ;;  %1232 = vmatpush.msra.mxu3 %v3319_v16 }
 0x27e   :  { %1173 = vmatpush.msra.mxu0 %v3320_v20  ;;  %1193 = vmatpush.msra.mxu1 %v3321_v36 }
 0x27f   :  { %1213 = vmatpush.msra.mxu2 %v3322_v46  ;;  %1233 = vmatpush.msra.mxu3 %v3323_v30 }
 0x280   :  { %1174 = vmatpush.msra.mxu0 %v3324_v57  ;;  %1194 = vmatpush.msra.mxu1 %v3325_v37 }
 0x281   :  { %1214 = vmatpush.msra.mxu2 %v3326_v38  ;;  %1234 = vmatpush.msra.mxu3 %v3327_v34 }
 0x282   :  { %1175 = vmatpush.msra.mxu0 %v3328_v32  ;;  %1195 = vmatpush.msra.mxu1 %v3329_v33 }
 0x283   :  { %1215 = vmatpush.msra.mxu2 %v3330_v50  ;;  %1235 = vmatpush.msra.mxu3 %v3331_v28  ;;  %v3351_v28 = vld [vmem:[#allocation48_spill] sm:$0xff] }
 0x284   :  { %1176 = vmatpush.msra.mxu0 %v3332_v29  ;;  %1196 = vmatpush.msra.mxu1 %v3333_v26  ;;  %v3350_v29 = vld [vmem:[#allocation47_spill] sm:$0xff] }
 0x285   :  { %1216 = vmatpush.msra.mxu2 %v3334_v43  ;;  %1236 = vmatpush.msra.mxu3 %v3335_v25  ;;  %v3348_v25 = vld [vmem:[#allocation45_spill] sm:$0xff]  ;;  %v3349_v43 = vld [vmem:[#allocation46_spill] sm:$0xff] }
 0x286   :  { %1177 = vmatpush.msra.mxu0 %v3336_v40  ;;  %1197 = vmatpush.msra.mxu1 %v3337_v27  ;;  %v3347_v40 = vld [vmem:[#allocation33_spill] sm:$0xff] }
 0x287   :  { %1217 = vmatpush.msra.mxu2 %v3338_v1  ;;  %1237 = vmatpush.msra.mxu3 %v3339_v41 }
 0x288   :  { %1178 = vmatpush.msra.mxu0 %v3340_v35  ;;  %1198 = vmatpush.msra.mxu1 %v3341_v22 }
 0x289   :  { %1218 = vmatpush.msra.mxu2 %v3342_v21  ;;  %1238 = vmatpush.msra.mxu3 %v3343_v23 }
 0x28a   :  { %1179 = vmatpush.msra.mxu0 %v3344_v24  ;;  %1199 = vmatpush.msra.mxu1 %v3345_v19 }
 0x28b   :  { %1219 = vmatpush.msra.mxu2 %v3346_v17  ;;  %1239 = vmatpush.msra.mxu3 %v3347_v40 }
 0x2e7   :  { %v847_v27 = vpop.f32.mrf.mxu0  ;;  %v867_v1 = vpop.f32.mrf.mxu1 }
 0x2e8   :  { %v910_v41 = vadd.f32 %v847_v27, %v3348_v25  ;;  %v911_v35 = vadd.f32 %v867_v1, %v3349_v43 }
 0x2ea   :  { %v1735_v26 = vmul.f32 -1.442695, %v910_v41  ;;  %v1736_v22 = vmul.f32 -1.442695, %v911_v35 }
 0x2ec   :  { %1820 = vpow2.f32 %v1735_v26 }
 0x2ed   :  { %1822 = vpow2.f32 %v1736_v22 }
 0x2ee   :  { %v887_v21 = vpop.f32.mrf.mxu2  ;;  %v907_v23 = vpop.f32.mrf.mxu3 }
 0x2ef   :  { %v912_v24 = vadd.f32 %v887_v21, %v3350_v29  ;;  %v913_v19 = vadd.f32 %v907_v23, %v3351_v28 }
 0x2f1   :  { %v1737_v50 = vmul.f32 -1.442695, %v912_v24  ;;  %v1738_v17 = vmul.f32 -1.442695, %v913_v19 }
 0x2f2   :  { %v1821_v33 = vpop.eup %1820 }
 0x2f3   :  { %v1823_v40 = vpop.eup %1822  ;;  %v926_v32 = vadd.f32 1.0, %v1821_v33  ;;  %1824 = vpow2.f32 %v1737_v50 }
 0x2f4   :  { %v927_v34 = vadd.f32 1.0, %v1823_v40  ;;  %1826 = vpow2.f32 %v1738_v17 }
 0x2f5   :  { %1828 = vrcp.f32 %v926_v32  ;;  %vm935_vm8 = vweird.f32 %v926_v32 }
 0x2f6   :  { %1830 = vrcp.f32 %v927_v34  ;;  %vm950_vm4 = vweird.f32 %v927_v34  ;;  %v956_v37 = vand.u32 2147483648, %v927_v34 }
 0x2f9   :  { %v1825_v43 = vpop.eup %1824 }
 0x2fa   :  { %v1827_v25 = vpop.eup %1826  ;;  %v928_v41 = vadd.f32 1.0, %v1825_v43  ;;  %v954_v43 = vand.u32 2147483647, %v927_v34 }
 0x2fb   :  { %v1829_v26 = vpop.eup %1828  ;;  %v929_v27 = vadd.f32 1.0, %v1827_v25 }
 0x2fc   :  { %v1831_v1 = vpop.eup %1830  ;;  %v931_v29 = vmul.f32 %v1829_v26, %v926_v32  ;;  %vm936_vm5 = vweird.f32 %v1829_v26  ;;  %vm955_vm12 = vcmp.eq.f32.partialorder %v954_v43, 8.507059e+37  ;;  %vm965_vm15 = vweird.f32 %v928_v41  ;;  %v3363_v43 = vld [vmem:[#allocation16_spill] sm:$0xff] }
 0x2fd   :  { %v946_v35 = vmul.f32 %v1831_v1, %v927_v34  ;;  %1832 = vrcp.f32 %v929_v27  ;;  %vm951_vm2 = vweird.f32 %v1831_v1  ;;  %v986_v19 = vand.u32 2147483648, %v929_v27  ;;  %vm937_vm11 = vmor %vm935_vm8, %vm936_vm5 }
 0x2fe   :  { %1834 = vrcp.f32 %v928_v41  ;;  %v932_v22 = vsub.f32 1.0, %v931_v29  ;;  %v984_v25 = vand.u32 2147483647, %v929_v27  ;;  %vm2879_vm6 = vmor %vm950_vm4, %vm951_vm2  ;;  %vm980_vm7 = vweird.f32 %v929_v27 }
 0x2ff   :  { %v947_v28 = vsub.f32 1.0, %v946_v35  ;;  %v957_v34 = vor.u32 1.1754944e-38, %v956_v37 }
 0x300   :  { %v933_v40 = vmul.f32 %v1829_v26, %v932_v22  ;;  %v987_v22 = vor.u32 1.1754944e-38, %v986_v19  ;;  %vm985_vm10 = vcmp.eq.f32.partialorder %v984_v25, 8.507059e+37  ;;  %v3362_v25 = vld [vmem:[#allocation15_spill] sm:$0xff] }
 0x301   :  { %v948_v23 = vmul.f32 %v1831_v1, %v947_v28  ;;  %v941_v28 = vand.u32 2147483648, %v926_v32 }
 0x302   :  { %v934_v30 = vadd.f32 %v1829_v26, %v933_v40 }
 0x303   :  { %v1833_v21 = vpop.eup %1832  ;;  %v949_v17 = vadd.f32 %v1831_v1, %v948_v23  ;;  %v939_v23 = vand.u32 2147483647, %v926_v32  ;;  %v942_v16 = vor.u32 1.1754944e-38, %v941_v28  ;;  %v3365_v28 = vld [vmem:[#allocation18_spill] sm:$0xff] }
 0x304   :  { %v976_v33 = vmul.f32 %v1833_v21, %v929_v27  ;;  %v1835_v50 = vpop.eup %1834  ;;  %vm981_vm3 = vweird.f32 %v1833_v21  ;;  %v938_v36 = vsel %vm937_vm11, %v1829_v26, %v934_v30  ;;  %v969_v30 = vand.u32 2147483647, %v928_v41  ;;  %v3358_v26 = vld [vmem:[#allocation11_spill] sm:$0xff] }
 0x305   :  { %v961_v57 = vmul.f32 %v1835_v50, %v928_v41  ;;  %vm982_vm9 = vmor %vm980_vm7, %vm981_vm3  ;;  %vm940_vm13 = vcmp.eq.f32.partialorder %v939_v23, 8.507059e+37  ;;  %vm966_vm14 = vweird.f32 %v1835_v50  ;;  %v3367_v23 = vld [vmem:[#allocation20_spill] sm:$0xff] }
 0x306   :  { %v977_v24 = vsub.f32 1.0, %v976_v33  ;;  %v953_v33 = vsel %vm2879_vm6, %v1831_v1, %v949_v17  ;;  %v943_v15 = vsel %vm940_vm13, %v942_v16, %v938_v36  ;;  %vm967_vm0 = vmor %vm965_vm15, %vm966_vm14  ;;  %vm970_vm1 = vcmp.eq.f32.partialorder %v969_v30, 8.507059e+37  ;;  %v3357_v36 = vld [vmem:[#allocation10_spill] sm:$0xff]  ;;  %v3378_v30 = vld [vmem:[#allocation31_spill] sm:$0xff] }
 0x307   :  { %v962_v40 = vsub.f32 1.0, %v961_v57  ;;  %v3361_v17 = vld [vmem:[#allocation14_spill] sm:$0xff] }
 0x308   :  { %v978_v38 = vmul.f32 %v1833_v21, %v977_v24 }
 0x309   :  { %v963_v39 = vmul.f32 %v1835_v50, %v962_v40  ;;  %v3371_v40 = vld [vmem:[#allocation24_spill] sm:$0xff] }
 0x30a   :  { %v979_v29 = vadd.f32 %v1833_v21, %v978_v38  ;;  %v958_v38 = vsel %vm955_vm12, %v957_v34, %v953_v33  ;;  %v3368_v33 = vld [vmem:[#allocation17_spill] sm:$0xff]  ;;  %v3370_v34 = vld [vmem:[#allocation23_spill] sm:$0xff] }
 0x30b   :  { %v992_v32 = vmul.f32 %v958_v38, %v2808_v48  ;;  %v964_v1 = vadd.f32 %v1835_v50, %v963_v39  ;;  %v3354_v48 = vld [vmem:[#allocation7_spill] sm:$0xff]  ;;  %v3355_v39 = vld [vmem:[#allocation8_spill] sm:$0xff]  ;;  %v3372_v38 = vld [vmem:[#allocation21_spill] sm:$0xff] }
 0x30c   :  { %v983_v24 = vsel %vm982_vm9, %v1833_v21, %v979_v29  ;;  %v971_v21 = vand.u32 2147483648, %v928_v41  ;;  %v3359_v41 = vld [vmem:[#allocation12_spill] sm:$0xff]  ;;  %v3364_v29 = vld [vmem:[#allocation13_spill] sm:$0xff] }
 0x30d   :  { %v988_v46 = vsel %vm985_vm10, %v987_v22, %v983_v24  ;;  %v3366_v22 = vld [vmem:[#allocation19_spill] sm:$0xff]  ;;  %v3369_v24 = vld [vmem:[#allocation22_spill] sm:$0xff] }
 0x30e   :  { %v990_v20 = vmul.f32 2.0, %v988_v46  ;;  %v968_v46 = vsel %vm967_vm0, %v1835_v50, %v964_v1  ;;  %v972_v57 = vor.u32 1.1754944e-38, %v971_v21  ;;  %v3360_v50 = vld [vmem:[#allocation9_spill] sm:$0xff]  ;;  %v3377_v21 = vld [vmem:[#allocation30_spill] sm:$0xff] }
 0x30f   :  { %v3376_v1 = vld [vmem:[#allocation25_spill] sm:$0xff] }
 0x310   :  { %v1739_v27 = vadd.f32 -1.0, %v990_v20  ;;  %v973_v20 = vsel %vm970_vm1, %v972_v57, %v968_v46  ;;  %v3379_v46 = vld [vmem:[#allocation32_spill] sm:$0xff]  ;;  %v3380_v57 = vld [vmem:[#allocation29_spill] sm:$0xff] }
 0x312   :  { %v993_v19 = vmul.f32 %v1739_v27, %v943_v15  ;;  %v3356_v15 = vld [vmem:[#allocation6_spill] sm:$0xff] }
 0x313   :  { %v3373_v27 = vld [vmem:[#allocation26_spill] sm:$0xff] }
 0x314   :  { %v2886_v35 = vadd.f32 %v993_v19, %v992_v32  ;;  %v3374_v32 = vld [vmem:[#allocation27_spill] sm:$0xff]  ;;  %v3375_v19 = vld [vmem:[#allocation28_spill] sm:$0xff] }
 0x316   :  { %1836 = vtanh.f32 %v2886_v35 }
 0x31c   :  { %v1837_v37 = vpop.eup %1836 }
 0x31d   :  { %v996_v16 = vmul.f32 %v1837_v37, %v973_v20  ;;  %v3381_v37 = vld [vmem:[#allocation34_spill] sm:$0xff]  ;;  %v3382_v20 = vld [vmem:[#allocation35_spill] sm:$0xff] }
 0x31f   :  { %1013 = vmatmul.f32.vlgmr.msrb.gmra.mxu0 %v996_v16  ;;  %1033 = vmatmul.f32.vlgmr.msrb.gmra.mxu1 %v996_v16 }
 0x320   :  { %1053 = vmatmul.f32.vlgmr.msrb.gmra.mxu2 %v996_v16  ;;  %1073 = vmatmul.f32.vlgmr.msrb.gmra.mxu3 %v996_v16  ;;  %v3383_v16 = vld [vmem:[#allocation36_spill] sm:$0xff] }
 0x321   :  { %1331 = vmatpush.msrb.mxu0 %v2605_v42  ;;  %1351 = vmatpush.msrb.mxu1 %v2608_v51 }
 0x322   :  { %1371 = vmatpush.msrb.mxu2 %v2611_v62  ;;  %1391 = vmatpush.msrb.mxu3 %v2614_v31 }
 0x323   :  { %1332 = vmatpush.msrb.mxu0 %v2617_v53  ;;  %1352 = vmatpush.msrb.mxu1 %v2620_v61 }
 0x324   :  { %1372 = vmatpush.msrb.mxu2 %v2623_v58  ;;  %1392 = vmatpush.msrb.mxu3 %v2626_v0 }
 0x325   :  { %1333 = vmatpush.msrb.mxu0 %v2629_v54  ;;  %1353 = vmatpush.msrb.mxu1 %v2632_v4 }
 0x326   :  { %1373 = vmatpush.msrb.mxu2 %v2635_v56  ;;  %1393 = vmatpush.msrb.mxu3 %v2638_v3 }
 0x327   :  { %1334 = vmatpush.msrb.mxu0 %v2641_v49  ;;  %1354 = vmatpush.msrb.mxu1 %v2644_v60 }
 0x328   :  { %1374 = vmatpush.msrb.mxu2 %v2647_v18  ;;  %1394 = vmatpush.msrb.mxu3 %v2650_v44 }
 0x329   :  { %1335 = vmatpush.msrb.mxu0 %v2653_v5  ;;  %1355 = vmatpush.msrb.mxu1 %v2656_v52 }
 0x32a   :  { %1375 = vmatpush.msrb.mxu2 %v2659_v59  ;;  %1395 = vmatpush.msrb.mxu3 %v2662_v2 }
 0x32b   :  { %1336 = vmatpush.msrb.mxu0 %v2665_v45  ;;  %1356 = vmatpush.msrb.mxu1 %v2668_v63 }
 0x32c   :  { %1376 = vmatpush.msrb.mxu2 %v2671_v55  ;;  %1396 = vmatpush.msrb.mxu3 %v2674_v47 }
 0x32d   :  { %1337 = vmatpush.msrb.mxu0 %v2677_v6  ;;  %1357 = vmatpush.msrb.mxu1 %v2680_v7 }
 0x32e   :  { %1377 = vmatpush.msrb.mxu2 %v2683_v8  ;;  %1397 = vmatpush.msrb.mxu3 %v2686_v9 }
 0x32f   :  { %1338 = vmatpush.msrb.mxu0 %v2689_v10  ;;  %1358 = vmatpush.msrb.mxu1 %v2692_v11 }
 0x330   :  { %1378 = vmatpush.msrb.mxu2 %v2695_v12  ;;  %1398 = vmatpush.msrb.mxu3 %v2698_v13 }
 0x331   :  { %1339 = vmatpush.msrb.mxu0 %v2701_v14  ;;  %1359 = vmatpush.msrb.mxu1 %v3354_v48 }
 0x332   :  { %1379 = vmatpush.msrb.mxu2 %v3355_v39  ;;  %1399 = vmatpush.msrb.mxu3 %v3356_v15 }
 0x333   :  { %1340 = vmatpush.msrb.mxu0 %v3357_v36  ;;  %1360 = vmatpush.msrb.mxu1 %v3358_v26 }
 0x334   :  { %1380 = vmatpush.msrb.mxu2 %v3359_v41  ;;  %1400 = vmatpush.msrb.mxu3 %v3360_v50 }
 0x335   :  { %1341 = vmatpush.msrb.mxu0 %v3361_v17  ;;  %1361 = vmatpush.msrb.mxu1 %v3362_v25 }
 0x336   :  { %1381 = vmatpush.msrb.mxu2 %v3363_v43  ;;  %1401 = vmatpush.msrb.mxu3 %v3364_v29 }
 0x337   :  { %1342 = vmatpush.msrb.mxu0 %v3365_v28  ;;  %1362 = vmatpush.msrb.mxu1 %v3366_v22 }
 0x338   :  { %1382 = vmatpush.msrb.mxu2 %v3367_v23  ;;  %1402 = vmatpush.msrb.mxu3 %v3368_v33  ;;  %v3388_v33 = vld [vmem:[#allocation52_spill] sm:$0xff] }
 0x339   :  { %1343 = vmatpush.msrb.mxu0 %v3369_v24  ;;  %1363 = vmatpush.msrb.mxu1 %v3370_v34  ;;  %v3387_v24 = vld [vmem:[#allocation51_spill] sm:$0xff] }
 0x33a   :  { %1383 = vmatpush.msrb.mxu2 %v3371_v40  ;;  %1403 = vmatpush.msrb.mxu3 %v3372_v38  ;;  %v3385_v38 = vld [vmem:[#allocation49_spill] sm:$0xff]  ;;  %v3386_v40 = vld [vmem:[#allocation50_spill] sm:$0xff] }
 0x33b   :  { %1344 = vmatpush.msrb.mxu0 %v3373_v27  ;;  %1364 = vmatpush.msrb.mxu1 %v3374_v32  ;;  %v3384_v27 = vld [vmem:[#allocation33_spill] sm:$0xff] }
 0x33c   :  { %1384 = vmatpush.msrb.mxu2 %v3375_v19  ;;  %1404 = vmatpush.msrb.mxu3 %v3376_v1 }
 0x33d   :  { %1345 = vmatpush.msrb.mxu0 %v3377_v21  ;;  %1365 = vmatpush.msrb.mxu1 %v3378_v30 }
 0x33e   :  { %1385 = vmatpush.msrb.mxu2 %v3379_v46  ;;  %1405 = vmatpush.msrb.mxu3 %v3380_v57 }
 0x33f   :  { %1346 = vmatpush.msrb.mxu0 %v3381_v37  ;;  %1366 = vmatpush.msrb.mxu1 %v3382_v20 }
 0x340   :  { %1386 = vmatpush.msrb.mxu2 %v3383_v16  ;;  %1406 = vmatpush.msrb.mxu3 %v3384_v27 }
 0x39c   :  { %v1014_v32 = vpop.f32.mrf.mxu0  ;;  %v1034_v19 = vpop.f32.mrf.mxu1 }
 0x39d   :  { %v1077_v1 = vadd.f32 %v1014_v32, %v3385_v38  ;;  %v1078_v21 = vadd.f32 %v1034_v19, %v3386_v40 }
 0x39f   :  { %v1740_v34 = vmul.f32 -1.442695, %v1077_v1  ;;  %v1741_v30 = vmul.f32 -1.442695, %v1078_v21 }
 0x3a1   :  { %1838 = vpow2.f32 %v1740_v34 }
 0x3a2   :  { %1840 = vpow2.f32 %v1741_v30 }
 0x3a3   :  { %v1054_v46 = vpop.f32.mrf.mxu2  ;;  %v1074_v57 = vpop.f32.mrf.mxu3 }
 0x3a4   :  { %v1079_v37 = vadd.f32 %v1054_v46, %v3387_v24  ;;  %v1080_v20 = vadd.f32 %v1074_v57, %v3388_v33 }
 0x3a6   :  { %v1742_v23 = vmul.f32 -1.442695, %v1079_v37  ;;  %v1743_v16 = vmul.f32 -1.442695, %v1080_v20 }
 0x3a7   :  { %v1839_v22 = vpop.eup %1838 }
 0x3a8   :  { %v1841_v27 = vpop.eup %1840  ;;  %v1093_v28 = vadd.f32 1.0, %v1839_v22  ;;  %1842 = vpow2.f32 %v1742_v23 }
 0x3a9   :  { %v1094_v29 = vadd.f32 1.0, %v1841_v27  ;;  %1844 = vpow2.f32 %v1743_v16 }
 0x3aa   :  { %1846 = vrcp.f32 %v1093_v28  ;;  %vm1102_vm8 = vweird.f32 %v1093_v28 }
 0x3ab   :  { %1848 = vrcp.f32 %v1094_v29  ;;  %vm1117_vm4 = vweird.f32 %v1094_v29  ;;  %v1123_v25 = vand.u32 2147483648, %v1094_v29 }
 0x3ae   :  { %v1843_v40 = vpop.eup %1842 }
 0x3af   :  { %v1845_v38 = vpop.eup %1844  ;;  %v1095_v1 = vadd.f32 1.0, %v1843_v40  ;;  %v1121_v40 = vand.u32 2147483647, %v1094_v29 }
 0x3b0   :  { %v1847_v34 = vpop.eup %1846  ;;  %v1096_v32 = vadd.f32 1.0, %v1845_v38 }
 0x3b1   :  { %v1849_v19 = vpop.eup %1848  ;;  %v1098_v24 = vmul.f32 %v1847_v34, %v1093_v28  ;;  %vm1103_vm5 = vweird.f32 %v1847_v34  ;;  %vm1122_vm12 = vcmp.eq.f32.partialorder %v1121_v40, 8.507059e+37  ;;  %vm1132_vm15 = vweird.f32 %v1095_v1 }
 0x3b2   :  { %v1113_v21 = vmul.f32 %v1849_v19, %v1094_v29  ;;  %1850 = vrcp.f32 %v1096_v32  ;;  %vm1118_vm2 = vweird.f32 %v1849_v19  ;;  %v1153_v20 = vand.u32 2147483648, %v1096_v32  ;;  %vm1104_vm11 = vmor %vm1102_vm8, %vm1103_vm5 }
 0x3b3   :  { %1852 = vrcp.f32 %v1095_v1  ;;  %v1099_v30 = vsub.f32 1.0, %v1098_v24  ;;  %v1151_v38 = vand.u32 2147483647, %v1096_v32  ;;  %vm2957_vm6 = vmor %vm1117_vm4, %vm1118_vm2  ;;  %vm1147_vm7 = vweird.f32 %v1096_v32 }
 0x3b4   :  { %v1114_v33 = vsub.f32 1.0, %v1113_v21  ;;  %v1124_v29 = vor.u32 1.1754944e-38, %v1123_v25 }
 0x3b5   :  { %v1100_v27 = vmul.f32 %v1847_v34, %v1099_v30  ;;  %v1154_v30 = vor.u32 1.1754944e-38, %v1153_v20  ;;  %vm1152_vm10 = vcmp.eq.f32.partialorder %v1151_v38, 8.507059e+37  ;;  %v3424_v38 = vld [vmem:[#allocation55_spill] sm:$0xff] }
 0x3b6   :  { %v1115_v57 = vmul.f32 %v1849_v19, %v1114_v33  ;;  %v1108_v33 = vand.u32 2147483648, %v1093_v28 }
 0x3b7   :  { %v1101_v50 = vadd.f32 %v1847_v34, %v1100_v27 }
 0x3b8   :  { %v1851_v46 = vpop.eup %1850  ;;  %v1116_v16 = vadd.f32 %v1849_v19, %v1115_v57  ;;  %v1106_v57 = vand.u32 2147483647, %v1093_v28  ;;  %v1109_v15 = vor.u32 1.1754944e-38, %v1108_v33 }
 0x3b9   :  { %v1143_v22 = vmul.f32 %v1851_v46, %v1096_v32  ;;  %v1853_v23 = vpop.eup %1852  ;;  %vm1148_vm3 = vweird.f32 %v1851_v46  ;;  %v1105_v26 = vsel %vm1104_vm11, %v1847_v34, %v1101_v50  ;;  %v1136_v50 = vand.u32 2147483647, %v1095_v1 }
 0x3ba   :  { %v1128_v17 = vmul.f32 %v1853_v23, %v1095_v1  ;;  %vm1149_vm9 = vmor %vm1147_vm7, %vm1148_vm3  ;;  %vm1107_vm13 = vcmp.eq.f32.partialorder %v1106_v57, 8.507059e+37  ;;  %vm1133_vm14 = vweird.f32 %v1853_v23 }
 0x3bb   :  { %v1144_v37 = vsub.f32 1.0, %v1143_v22  ;;  %v1120_v22 = vsel %vm2957_vm6, %v1849_v19, %v1116_v16  ;;  %v1110_v39 = vsel %vm1107_vm13, %v1109_v15, %v1105_v26  ;;  %vm1134_vm0 = vmor %vm1132_vm15, %vm1133_vm14  ;;  %vm1137_vm1 = vcmp.eq.f32.partialorder %v1136_v50, 8.507059e+37 }
 0x3bc   :  { %v1129_v27 = vsub.f32 1.0, %v1128_v17 }
 0x3bd   :  { %v1145_v43 = vmul.f32 %v1851_v46, %v1144_v37 }
 0x3be   :  { %v1130_v48 = vmul.f32 %v1853_v23, %v1129_v27 }
 0x3bf   :  { %v1146_v24 = vadd.f32 %v1851_v46, %v1145_v43  ;;  %v1125_v43 = vsel %vm1122_vm12, %v1124_v29, %v1120_v22 }
 0x3c0   :  { %v1159_v28 = vmul.f32 %v1125_v43, %v2886_v35  ;;  %v1131_v19 = vadd.f32 %v1853_v23, %v1130_v48  ;;  %v3422_v35 = vld [vmem:[#allocation53_spill] sm:$0xff] }
 0x3c1   :  { %v1150_v37 = vsel %vm1149_vm9, %v1851_v46, %v1146_v24  ;;  %v1138_v46 = vand.u32 2147483648, %v1095_v1  ;;  %v3425_v24 = vld [vmem:[#allocation56_spill] sm:$0xff] }
 0x3c2   :  { %v1155_v41 = vsel %vm1152_vm10, %v1154_v30, %v1150_v37 }
 0x3c3   :  { %v1157_v36 = vmul.f32 2.0, %v1155_v41  ;;  %v1135_v41 = vsel %vm1134_vm0, %v1853_v23, %v1131_v19  ;;  %v1139_v17 = vor.u32 1.1754944e-38, %v1138_v46 }
 0x3c5   :  { %v1744_v32 = vadd.f32 -1.0, %v1157_v36  ;;  %v1140_v36 = vsel %vm1137_vm1, %v1139_v17, %v1135_v41 }
 0x3c7   :  { %v1160_v20 = vmul.f32 %v1744_v32, %v1110_v39  ;;  %v3423_v39 = vld [vmem:[#allocation54_spill] sm:$0xff] }
 0x3c9   :  { %v2964_v21 = vadd.f32 %v1160_v20, %v1159_v28 }
 0x3cb   :  { %1854 = vtanh.f32 %v2964_v21 }
 0x3d1   :  { %v1855_v25 = vpop.eup %1854 }
 0x3d2   :  { %v1163_v15 = vmul.f32 %v1855_v25, %v1140_v36 }
 0x3d4   :  { %1180 = vmatmul.f32.vlgmr.msra.gmra.mxu0 %v1163_v15  ;;  %1200 = vmatmul.f32.vlgmr.msra.gmra.mxu1 %v1163_v15 }
 0x3d5   :  { %1220 = vmatmul.f32.vlgmr.msra.gmra.mxu2 %v1163_v15  ;;  %1240 = vmatmul.f32.vlgmr.msra.gmra.mxu3 %v1163_v15 }
 0x3d6   :  { %1498 = vmatpush.msra.mxu0 %v2605_v42  ;;  %1518 = vmatpush.msra.mxu1 %v2608_v51  ;;  %v3391_v42 = vld [vmem:[#allocation7_spill] sm:$0xff]  ;;  %v3392_v51 = vld [vmem:[#allocation8_spill] sm:$0xff] }
 0x3d7   :  { %1538 = vmatpush.msra.mxu2 %v2611_v62  ;;  %1558 = vmatpush.msra.mxu3 %v2614_v31  ;;  %v3393_v62 = vld [vmem:[#allocation6_spill] sm:$0xff] }
 0x3d8   :  { %1499 = vmatpush.msra.mxu0 %v2617_v53  ;;  %1519 = vmatpush.msra.mxu1 %v2620_v61  ;;  %v3394_v31 = vld [vmem:[#allocation10_spill] sm:$0xff]  ;;  %v3395_v53 = vld [vmem:[#allocation11_spill] sm:$0xff]  ;;  %v3396_v61 = vld [vmem:[#allocation12_spill] sm:$0xff] }
 0x3d9   :  { %1539 = vmatpush.msra.mxu2 %v2623_v58  ;;  %1559 = vmatpush.msra.mxu3 %v2626_v0  ;;  %v3397_v58 = vld [vmem:[#allocation9_spill] sm:$0xff]  ;;  %v3398_v0 = vld [vmem:[#allocation14_spill] sm:$0xff] }
 0x3da   :  { %1500 = vmatpush.msra.mxu0 %v2629_v54  ;;  %1520 = vmatpush.msra.mxu1 %v2632_v4  ;;  %v3399_v54 = vld [vmem:[#allocation15_spill] sm:$0xff]  ;;  %v3400_v4 = vld [vmem:[#allocation16_spill] sm:$0xff] }
 0x3db   :  { %1540 = vmatpush.msra.mxu2 %v2635_v56  ;;  %1560 = vmatpush.msra.mxu3 %v2638_v3  ;;  %v3401_v56 = vld [vmem:[#allocation13_spill] sm:$0xff]  ;;  %v3402_v3 = vld [vmem:[#allocation18_spill] sm:$0xff] }
 0x3dc   :  { %1501 = vmatpush.msra.mxu0 %v2641_v49  ;;  %1521 = vmatpush.msra.mxu1 %v2644_v60  ;;  %v3403_v49 = vld [vmem:[#allocation19_spill] sm:$0xff]  ;;  %v3404_v60 = vld [vmem:[#allocation20_spill] sm:$0xff] }
 0x3dd   :  { %1541 = vmatpush.msra.mxu2 %v2647_v18  ;;  %1561 = vmatpush.msra.mxu3 %v2650_v44  ;;  %v3405_v18 = vld [vmem:[#allocation17_spill] sm:$0xff]  ;;  %v3406_v44 = vld [vmem:[#allocation22_spill] sm:$0xff] }
 0x3de   :  { %1502 = vmatpush.msra.mxu0 %v2653_v5  ;;  %1522 = vmatpush.msra.mxu1 %v2656_v52  ;;  %v3407_v5 = vld [vmem:[#allocation23_spill] sm:$0xff]  ;;  %v3408_v52 = vld [vmem:[#allocation24_spill] sm:$0xff] }
 0x3df   :  { %1542 = vmatpush.msra.mxu2 %v2659_v59  ;;  %1562 = vmatpush.msra.mxu3 %v2662_v2  ;;  %v3409_v59 = vld [vmem:[#allocation21_spill] sm:$0xff]  ;;  %v3410_v2 = vld [vmem:[#allocation26_spill] sm:$0xff] }
 0x3e0   :  { %1503 = vmatpush.msra.mxu0 %v2665_v45  ;;  %1523 = vmatpush.msra.mxu1 %v2668_v63  ;;  %v3411_v45 = vld [vmem:[#allocation27_spill] sm:$0xff]  ;;  %v3412_v63 = vld [vmem:[#allocation28_spill] sm:$0xff] }
 0x3e1   :  { %1543 = vmatpush.msra.mxu2 %v2671_v55  ;;  %1563 = vmatpush.msra.mxu3 %v2674_v47  ;;  %v3413_v55 = vld [vmem:[#allocation25_spill] sm:$0xff]  ;;  %v3414_v47 = vld [vmem:[#allocation30_spill] sm:$0xff] }
 0x3e2   :  { %1504 = vmatpush.msra.mxu0 %v2677_v6  ;;  %1524 = vmatpush.msra.mxu1 %v2680_v7  ;;  %v3415_v6 = vld [vmem:[#allocation31_spill] sm:$0xff]  ;;  %v3416_v7 = vld [vmem:[#allocation32_spill] sm:$0xff] }
 0x3e3   :  { %1544 = vmatpush.msra.mxu2 %v2683_v8  ;;  %1564 = vmatpush.msra.mxu3 %v2686_v9  ;;  %v3417_v8 = vld [vmem:[#allocation29_spill] sm:$0xff]  ;;  %v3418_v9 = vld [vmem:[#allocation34_spill] sm:$0xff] }
 0x3e4   :  { %1505 = vmatpush.msra.mxu0 %v2689_v10  ;;  %1525 = vmatpush.msra.mxu1 %v2692_v11  ;;  %v3419_v10 = vld [vmem:[#allocation35_spill] sm:$0xff]  ;;  %v3420_v11 = vld [vmem:[#allocation36_spill] sm:$0xff] }
 0x3e5   :  { %1545 = vmatpush.msra.mxu2 %v2695_v12  ;;  %1565 = vmatpush.msra.mxu3 %v2698_v13  ;;  %v3421_v12 = vld [vmem:[#allocation33_spill] sm:$0xff] }
 0x3e6   :  { %1506 = vmatpush.msra.mxu0 %v2701_v14  ;;  %1526 = vmatpush.msra.mxu1 %v3391_v42 }
 0x3e7   :  { %1546 = vmatpush.msra.mxu2 %v3392_v51  ;;  %1566 = vmatpush.msra.mxu3 %v3393_v62 }
 0x3e8   :  { %1507 = vmatpush.msra.mxu0 %v3394_v31  ;;  %1527 = vmatpush.msra.mxu1 %v3395_v53 }
 0x3e9   :  { %1547 = vmatpush.msra.mxu2 %v3396_v61  ;;  %1567 = vmatpush.msra.mxu3 %v3397_v58 }
 0x3ea   :  { %1508 = vmatpush.msra.mxu0 %v3398_v0  ;;  %1528 = vmatpush.msra.mxu1 %v3399_v54 }
 0x3eb   :  { %1548 = vmatpush.msra.mxu2 %v3400_v4  ;;  %1568 = vmatpush.msra.mxu3 %v3401_v56 }
 0x3ec   :  { %1509 = vmatpush.msra.mxu0 %v3402_v3  ;;  %1529 = vmatpush.msra.mxu1 %v3403_v49 }
 0x3ed   :  { %1549 = vmatpush.msra.mxu2 %v3404_v60  ;;  %1569 = vmatpush.msra.mxu3 %v3405_v18 }
 0x3ee   :  { %1510 = vmatpush.msra.mxu0 %v3406_v44  ;;  %1530 = vmatpush.msra.mxu1 %v3407_v5 }
 0x3ef   :  { %1550 = vmatpush.msra.mxu2 %v3408_v52  ;;  %1570 = vmatpush.msra.mxu3 %v3409_v59 }
 0x3f0   :  { %1511 = vmatpush.msra.mxu0 %v3410_v2  ;;  %1531 = vmatpush.msra.mxu1 %v3411_v45 }
 0x3f1   :  { %1551 = vmatpush.msra.mxu2 %v3412_v63  ;;  %1571 = vmatpush.msra.mxu3 %v3413_v55 }
 0x3f2   :  { %1512 = vmatpush.msra.mxu0 %v3414_v47  ;;  %1532 = vmatpush.msra.mxu1 %v3415_v6 }
 0x3f3   :  { %1552 = vmatpush.msra.mxu2 %v3416_v7  ;;  %1572 = vmatpush.msra.mxu3 %v3417_v8 }
 0x3f4   :  { %1513 = vmatpush.msra.mxu0 %v3418_v9  ;;  %1533 = vmatpush.msra.mxu1 %v3419_v10 }
 0x3f5   :  { %1553 = vmatpush.msra.mxu2 %v3420_v11  ;;  %1573 = vmatpush.msra.mxu3 %v3421_v12 }
 0x451   :  { %v1181_v13 = vpop.f32.mrf.mxu0  ;;  %v1201_v14 = vpop.f32.mrf.mxu1 }
 0x452   :  { %v1244_v48 = vadd.f32 %v1181_v13, %v3422_v35  ;;  %v1245_v26 = vadd.f32 %v1201_v14, %v3423_v39 }
 0x454   :  { %v1745_v34 = vmul.f32 -1.442695, %v1244_v48  ;;  %v1746_v1 = vmul.f32 -1.442695, %v1245_v26 }
 0x456   :  { %1856 = vpow2.f32 %v1745_v34 }
 0x457   :  { %1858 = vpow2.f32 %v1746_v1 }
 0x458   :  { %v1221_v23 = vpop.f32.mrf.mxu2  ;;  %v1241_v16 = vpop.f32.mrf.mxu3 }
 0x459   :  { %v1246_v40 = vadd.f32 %v1221_v23, %v3424_v38  ;;  %v1247_v33 = vadd.f32 %v1241_v16, %v3425_v24  ;;  %v3428_v38 = vld [vmem:[#allocation57_spill] sm:$0xff]  ;;  %v3429_v24 = vld [vmem:[#allocation58_spill] sm:$0xff] }
 0x45b   :  { %v1747_v30 = vmul.f32 -1.442695, %v1246_v40  ;;  %v1748_v57 = vmul.f32 -1.442695, %v1247_v33 }
 0x45c   :  { %v1857_v22 = vpop.eup %1856 }
 0x45d   :  { %v1859_v37 = vpop.eup %1858  ;;  %v1260_v29 = vadd.f32 1.0, %v1857_v22  ;;  %1860 = vpow2.f32 %v1747_v30 }
 0x45e   :  { %v1261_v27 = vadd.f32 1.0, %v1859_v37  ;;  %1862 = vpow2.f32 %v1748_v57 }
 0x45f   :  { %1864 = vrcp.f32 %v1260_v29  ;;  %vm1269_vm8 = vweird.f32 %v1260_v29  ;;  %v1275_v18 = vand.u32 2147483648, %v1260_v29  ;;  %v1273_v5 = vand.u32 2147483647, %v1260_v29 }
 0x460   :  { %1866 = vrcp.f32 %v1261_v27  ;;  %vm1284_vm4 = vweird.f32 %v1261_v27  ;;  %v1288_v54 = vand.u32 2147483647, %v1261_v27  ;;  %v1290_v4 = vand.u32 2147483648, %v1261_v27 }
 0x461   :  { %v1276_v6 = vor.u32 1.1754944e-38, %v1275_v18  ;;  %vm1274_vm13 = vcmp.eq.f32.partialorder %v1273_v5, 8.507059e+37 }
 0x462   :  { %v1291_v2 = vor.u32 1.1754944e-38, %v1290_v4  ;;  %vm1289_vm12 = vcmp.eq.f32.partialorder %v1288_v54, 8.507059e+37 }
 0x463   :  { %v1861_v43 = vpop.eup %1860 }
 0x464   :  { %v1863_v32 = vpop.eup %1862  ;;  %v1262_v46 = vadd.f32 1.0, %v1861_v43  ;;  %v3431_v43 = vld [vmem:[#allocation60_spill] sm:$0xff] }
 0x465   :  { %v1865_v28 = vpop.eup %1864  ;;  %v1263_v20 = vadd.f32 1.0, %v1863_v32 }
 0x466   :  { %v1867_v19 = vpop.eup %1866  ;;  %v1265_v41 = vmul.f32 %v1865_v28, %v1260_v29  ;;  %vm1270_vm5 = vweird.f32 %v1865_v28  ;;  %v1305_v35 = vand.u32 2147483648, %v1262_v46  ;;  %vm1299_vm15 = vweird.f32 %v1262_v46  ;;  %v3430_v29 = vld [vmem:[#allocation59_spill] sm:$0xff] }
 0x467   :  { %v1280_v50 = vmul.f32 %v1867_v19, %v1261_v27  ;;  %1868 = vrcp.f32 %v1263_v20  ;;  %vm1285_vm2 = vweird.f32 %v1867_v19  ;;  %v1320_v53 = vand.u32 2147483648, %v1263_v20  ;;  %vm1271_vm11 = vmor %vm1269_vm8, %vm1270_vm5 }
 0x468   :  { %1870 = vrcp.f32 %v1262_v46  ;;  %v1266_v25 = vsub.f32 1.0, %v1265_v41  ;;  %v1318_v0 = vand.u32 2147483647, %v1263_v20  ;;  %vm3035_vm6 = vmor %vm1284_vm4, %vm1285_vm2  ;;  %vm1314_vm7 = vweird.f32 %v1263_v20 }
 0x469   :  { %v1281_v17 = vsub.f32 1.0, %v1280_v50  ;;  %v1321_v44 = vor.u32 1.1754944e-38, %v1320_v53  ;;  %v1303_v48 = vand.u32 2147483647, %v1262_v46  ;;  %v1306_v26 = vor.u32 1.1754944e-38, %v1305_v35 }
 0x46a   :  { %v1267_v62 = vmul.f32 %v1865_v28, %v1266_v25  ;;  %vm1319_vm10 = vcmp.eq.f32.partialorder %v1318_v0, 8.507059e+37 }
 0x46b   :  { %v1282_v15 = vmul.f32 %v1867_v19, %v1281_v17  ;;  %vm1304_vm1 = vcmp.eq.f32.partialorder %v1303_v48, 8.507059e+37 }
 0x46c   :  { %v1268_v3 = vadd.f32 %v1865_v28, %v1267_v62 }
 0x46d   :  { %v1869_v36 = vpop.eup %1868  ;;  %v1283_v61 = vadd.f32 %v1867_v19, %v1282_v15 }
 0x46e   :  { %v1310_v42 = vmul.f32 %v1869_v36, %v1263_v20  ;;  %v1871_v51 = vpop.eup %1870  ;;  %vm1315_vm3 = vweird.f32 %v1869_v36  ;;  %v1272_v55 = vsel %vm1271_vm11, %v1865_v28, %v1268_v3 }
 0x46f   :  { %v1295_v56 = vmul.f32 %v1871_v51, %v1262_v46  ;;  %vm1316_vm9 = vmor %vm1314_vm7, %vm1315_vm3  ;;  %v1287_v52 = vsel %vm3035_vm6, %v1867_v19, %v1283_v61  ;;  %v1277_v9 = vsel %vm1274_vm13, %v1276_v6, %v1272_v55  ;;  %vm1300_vm14 = vweird.f32 %v1871_v51 }
 0x470   :  { %v1311_v31 = vsub.f32 1.0, %v1310_v42  ;;  %v1292_v7 = vsel %vm1289_vm12, %v1291_v2, %v1287_v52  ;;  %vm1301_vm0 = vmor %vm1299_vm15, %vm1300_vm14 }
 0x471   :  { %v1296_v45 = vsub.f32 1.0, %v1295_v56  ;;  %v1326_v11 = vmul.f32 %v1292_v7, %v2964_v21 }
 0x472   :  { %v1312_v58 = vmul.f32 %v1869_v36, %v1311_v31 }
 0x473   :  { %v1297_v10 = vmul.f32 %v1871_v51, %v1296_v45 }
 0x474   :  { %v1313_v60 = vadd.f32 %v1869_v36, %v1312_v58 }
 0x475   :  { %v1298_v14 = vadd.f32 %v1871_v51, %v1297_v10 }
 0x476   :  { %v1317_v59 = vsel %vm1316_vm9, %v1869_v36, %v1313_v60 }
 0x477   :  { %v1322_v63 = vsel %vm1319_vm10, %v1321_v44, %v1317_v59  ;;  %v1302_v39 = vsel %vm1301_vm0, %v1871_v51, %v1298_v14 }
 0x478   :  { %v1324_v47 = vmul.f32 2.0, %v1322_v63  ;;  %v1307_v1 = vsel %vm1304_vm1, %v1306_v26, %v1302_v39 }
 0x47a   :  { %v1749_v8 = vadd.f32 -1.0, %v1324_v47 }
 0x47c   :  { %v1327_v12 = vmul.f32 %v1749_v8, %v1277_v9 }
 0x47e   :  { %v3042_v13 = vadd.f32 %v1327_v12, %v1326_v11 }
 0x480   :  { %1872 = vtanh.f32 %v3042_v13 }
 0x486   :  { %v1873_v34 = vpop.eup %1872 }
 0x487   :  { %v1330_v23 = vmul.f32 %v1873_v34, %v1307_v1 }
 0x489   :  { %1347 = vmatmul.f32.vlgmr.msrb.gmra.mxu0 %v1330_v23  ;;  %1367 = vmatmul.f32.vlgmr.msrb.gmra.mxu1 %v1330_v23 }
 0x48a   :  { %1387 = vmatmul.f32.vlgmr.msrb.gmra.mxu2 %v1330_v23  ;;  %1407 = vmatmul.f32.vlgmr.msrb.gmra.mxu3 %v1330_v23 }
 0x506   :  { %v1348_v21 = vpop.f32.mrf.mxu0  ;;  %v1368_v16 = vpop.f32.mrf.mxu1 }
 0x507   :  { %v1411_v40 = vadd.f32 %v1348_v21, %v3428_v38  ;;  %v1412_v33 = vadd.f32 %v1368_v16, %v3429_v24 }
 0x509   :  { %v1750_v30 = vmul.f32 -1.442695, %v1411_v40  ;;  %v1751_v57 = vmul.f32 -1.442695, %v1412_v33 }
 0x50b   :  { %1874 = vpow2.f32 %v1750_v30 }
 0x50c   :  { %1876 = vpow2.f32 %v1751_v57 }
 0x50d   :  { %v1388_v22 = vpop.f32.mrf.mxu2  ;;  %v1408_v37 = vpop.f32.mrf.mxu3 }
 0x50e   :  { %v1413_v27 = vadd.f32 %v1388_v22, %v3430_v29  ;;  %v1414_v32 = vadd.f32 %v1408_v37, %v3431_v43  ;;  %v3434_v29 = vld [vmem:[#allocation61_spill] sm:$0xff]  ;;  %v3435_v43 = vld [vmem:[#allocation62_spill] sm:$0xff] }
 0x510   :  { %v1752_v28 = vmul.f32 -1.442695, %v1413_v27  ;;  %v1753_v20 = vmul.f32 -1.442695, %v1414_v32 }
 0x511   :  { %v1875_v19 = vpop.eup %1874 }
 0x512   :  { %v1877_v46 = vpop.eup %1876  ;;  %v1427_v50 = vadd.f32 1.0, %v1875_v19  ;;  %1878 = vpow2.f32 %v1752_v28 }
 0x513   :  { %v1428_v41 = vadd.f32 1.0, %v1877_v46  ;;  %1880 = vpow2.f32 %v1753_v20 }
 0x514   :  { %1882 = vrcp.f32 %v1427_v50  ;;  %vm1436_vm8 = vweird.f32 %v1427_v50  ;;  %v1442_v55 = vand.u32 2147483648, %v1427_v50  ;;  %v1440_v6 = vand.u32 2147483647, %v1427_v50 }
 0x515   :  { %1884 = vrcp.f32 %v1428_v41  ;;  %vm1451_vm4 = vweird.f32 %v1428_v41  ;;  %v1455_v5 = vand.u32 2147483647, %v1428_v41  ;;  %v1457_v52 = vand.u32 2147483648, %v1428_v41 }
 0x516   :  { %v1443_v35 = vor.u32 1.1754944e-38, %v1442_v55  ;;  %vm1441_vm13 = vcmp.eq.f32.partialorder %v1440_v6, 8.507059e+37 }
 0x517   :  { %v1458_v9 = vor.u32 1.1754944e-38, %v1457_v52  ;;  %vm1456_vm12 = vcmp.eq.f32.partialorder %v1455_v5, 8.507059e+37 }
 0x518   :  { %v1879_v17 = vpop.eup %1878 }
 0x519   :  { %v1881_v25 = vpop.eup %1880  ;;  %v1429_v51 = vadd.f32 1.0, %v1879_v17  ;;  %v3437_v17 = vld [vmem:[#allocation64_spill] sm:$0xff] }
 0x51a   :  { %v1883_v36 = vpop.eup %1882  ;;  %v1430_v15 = vadd.f32 1.0, %v1881_v25 }
 0x51b   :  { %v1885_v42 = vpop.eup %1884  ;;  %v1432_v31 = vmul.f32 %v1883_v36, %v1427_v50  ;;  %vm1437_vm5 = vweird.f32 %v1883_v36  ;;  %v1472_v38 = vand.u32 2147483648, %v1429_v51  ;;  %vm1466_vm15 = vweird.f32 %v1429_v51  ;;  %v3436_v50 = vld [vmem:[#allocation63_spill] sm:$0xff] }
 0x51c   :  { %v1447_v62 = vmul.f32 %v1885_v42, %v1428_v41  ;;  %1886 = vrcp.f32 %v1430_v15  ;;  %vm1452_vm2 = vweird.f32 %v1885_v42  ;;  %v1487_v49 = vand.u32 2147483648, %v1430_v15  ;;  %vm1438_vm11 = vmor %vm1436_vm8, %vm1437_vm5 }
 0x51d   :  { %1888 = vrcp.f32 %v1429_v51  ;;  %v1433_v61 = vsub.f32 1.0, %v1432_v31  ;;  %v1485_v44 = vand.u32 2147483647, %v1430_v15  ;;  %vm3049_vm6 = vmor %vm1451_vm4, %vm1452_vm2  ;;  %vm1481_vm7 = vweird.f32 %v1430_v15 }
 0x51e   :  { %v1448_v53 = vsub.f32 1.0, %v1447_v62  ;;  %v1488_v47 = vor.u32 1.1754944e-38, %v1487_v49  ;;  %v1470_v40 = vand.u32 2147483647, %v1429_v51  ;;  %v1473_v33 = vor.u32 1.1754944e-38, %v1472_v38 }
 0x51f   :  { %v1434_v56 = vmul.f32 %v1883_v36, %v1433_v61  ;;  %vm1486_vm10 = vcmp.eq.f32.partialorder %v1485_v44, 8.507059e+37 }
 0x520   :  { %v1449_v0 = vmul.f32 %v1885_v42, %v1448_v53  ;;  %vm1471_vm1 = vcmp.eq.f32.partialorder %v1470_v40, 8.507059e+37 }
 0x521   :  { %v1435_v2 = vadd.f32 %v1883_v36, %v1434_v56 }
 0x522   :  { %v1887_v58 = vpop.eup %1886  ;;  %v1450_v60 = vadd.f32 %v1885_v42, %v1449_v0 }
 0x523   :  { %v1477_v54 = vmul.f32 %v1887_v58, %v1430_v15  ;;  %v1889_v4 = vpop.eup %1888  ;;  %vm1482_vm3 = vweird.f32 %v1887_v58  ;;  %v1439_v12 = vsel %vm1438_vm11, %v1883_v36, %v1435_v2 }
 0x524   :  { %v1462_v59 = vmul.f32 %v1889_v4, %v1429_v51  ;;  %vm1483_vm9 = vmor %vm1481_vm7, %vm1482_vm3  ;;  %v1454_v7 = vsel %vm3049_vm6, %v1885_v42, %v1450_v60  ;;  %v1444_v26 = vsel %vm1441_vm13, %v1443_v35, %v1439_v12  ;;  %vm1467_vm14 = vweird.f32 %v1889_v4 }
 0x525   :  { %v1478_v3 = vsub.f32 1.0, %v1477_v54  ;;  %v1459_v48 = vsel %vm1456_vm12, %v1458_v9, %v1454_v7  ;;  %vm1468_vm0 = vmor %vm1466_vm15, %vm1467_vm14 }
 0x526   :  { %v1463_v10 = vsub.f32 1.0, %v1462_v59  ;;  %v1493_v1 = vmul.f32 %v1459_v48, %v3042_v13 }
 0x527   :  { %v1479_v18 = vmul.f32 %v1887_v58, %v1478_v3 }
 0x528   :  { %v1464_v34 = vmul.f32 %v1889_v4, %v1463_v10 }
 0x529   :  { %v1480_v63 = vadd.f32 %v1887_v58, %v1479_v18 }
 0x52a   :  { %v1465_v16 = vadd.f32 %v1889_v4, %v1464_v34 }
 0x52b   :  { %v1484_v8 = vsel %vm1483_vm9, %v1887_v58, %v1480_v63 }
 0x52c   :  { %v1489_v11 = vsel %vm1486_vm10, %v1488_v47, %v1484_v8  ;;  %v1469_v24 = vsel %vm1468_vm0, %v1889_v4, %v1465_v16 }
 0x52d   :  { %v1491_v14 = vmul.f32 2.0, %v1489_v11  ;;  %v1474_v57 = vsel %vm1471_vm1, %v1473_v33, %v1469_v24 }
 0x52f   :  { %v1754_v39 = vadd.f32 -1.0, %v1491_v14 }
 0x531   :  { %v1494_v23 = vmul.f32 %v1754_v39, %v1444_v26 }
 0x533   :  { %v3056_v21 = vadd.f32 %v1494_v23, %v1493_v1 }
 0x535   :  { %1890 = vtanh.f32 %v3056_v21 }
 0x53b   :  { %v1891_v30 = vpop.eup %1890 }
 0x53c   :  { %v1497_v22 = vmul.f32 %v1891_v30, %v1474_v57 }
 0x53e   :  { %1514 = vmatmul.f32.vlgmr.msra.gmra.mxu0 %v1497_v22  ;;  %1534 = vmatmul.f32.vlgmr.msra.gmra.mxu1 %v1497_v22 }
 0x53f   :  { %1554 = vmatmul.f32.vlgmr.msra.gmra.mxu2 %v1497_v22  ;;  %1574 = vmatmul.f32.vlgmr.msra.gmra.mxu3 %v1497_v22 }
 0x5bb   :  { %v1515_v13 = vpop.f32.mrf.mxu0  ;;  %v1535_v37 = vpop.f32.mrf.mxu1 }
 0x5bc   :  { %v1578_v27 = vadd.f32 %v1515_v13, %v3434_v29  ;;  %v1579_v32 = vadd.f32 %v1535_v37, %v3435_v43 }
 0x5be   :  { %v1755_v28 = vmul.f32 -1.442695, %v1578_v27  ;;  %v1756_v20 = vmul.f32 -1.442695, %v1579_v32 }
 0x5c0   :  { %1892 = vpow2.f32 %v1755_v28  ;;  %v1764_v28 = vld [vmem:[%s3080_s4] ss:$0 sm:$0xff] }
 0x5c1   :  { %1894 = vpow2.f32 %v1756_v20 }
 0x5c2   :  { %v1555_v19 = vpop.f32.mrf.mxu2  ;;  %v1575_v46 = vpop.f32.mrf.mxu3 }
 0x5c3   :  { %v1580_v41 = vadd.f32 %v1555_v19, %v3436_v50  ;;  %v1581_v25 = vadd.f32 %v1575_v46, %v3437_v17  ;;  %v1765_v50 = vld [vmem:[#allocation2] ss:$0 sm:$0xff] }
 0x5c5   :  { %v1757_v36 = vmul.f32 -1.442695, %v1580_v41  ;;  %v1758_v15 = vmul.f32 -1.442695, %v1581_v25 }
 0x5c6   :  { %v1893_v42 = vpop.eup %1892 }
 0x5c7   :  { %v1895_v51 = vpop.eup %1894  ;;  %v1594_v62 = vadd.f32 1.0, %v1893_v42  ;;  %1896 = vpow2.f32 %v1757_v36 }
 0x5c8   :  { %v1595_v31 = vadd.f32 1.0, %v1895_v51  ;;  %1898 = vpow2.f32 %v1758_v15 }
 0x5c9   :  { %1900 = vrcp.f32 %v1594_v62  ;;  %vm1603_vm8 = vweird.f32 %v1594_v62  ;;  %v1609_v12 = vand.u32 2147483648, %v1594_v62  ;;  %v1607_v35 = vand.u32 2147483647, %v1594_v62 }
 0x5ca   :  { %1902 = vrcp.f32 %v1595_v31  ;;  %vm1618_vm4 = vweird.f32 %v1595_v31  ;;  %v1624_v6 = vand.u32 2147483648, %v1595_v31  ;;  %v1622_v7 = vand.u32 2147483647, %v1595_v31 }
 0x5cb   :  { %v1610_v38 = vor.u32 1.1754944e-38, %v1609_v12  ;;  %vm1608_vm13 = vcmp.eq.f32.partialorder %v1607_v35, 8.507059e+37 }
 0x5cc   :  { %v1625_v26 = vor.u32 1.1754944e-38, %v1624_v6  ;;  %vm1623_vm12 = vcmp.eq.f32.partialorder %v1622_v7, 8.507059e+37 }
 0x5cd   :  { %v1897_v53 = vpop.eup %1896 }
 0x5ce   :  { %v1899_v61 = vpop.eup %1898  ;;  %v1596_v4 = vadd.f32 1.0, %v1897_v53 }
 0x5cf   :  { %v1901_v58 = vpop.eup %1900  ;;  %v1597_v0 = vadd.f32 1.0, %v1899_v61 }
 0x5d0   :  { %v1903_v54 = vpop.eup %1902  ;;  %v1599_v3 = vmul.f32 %v1901_v58, %v1594_v62  ;;  %vm1604_vm5 = vweird.f32 %v1901_v58  ;;  %v1639_v29 = vand.u32 2147483648, %v1596_v4  ;;  %vm1633_vm15 = vweird.f32 %v1596_v4 }
 0x5d1   :  { %v1614_v56 = vmul.f32 %v1903_v54, %v1595_v31  ;;  %1904 = vrcp.f32 %v1597_v0  ;;  %vm1619_vm2 = vweird.f32 %v1903_v54  ;;  %v1654_v45 = vand.u32 2147483648, %v1597_v0  ;;  %vm1605_vm11 = vmor %vm1603_vm8, %vm1604_vm5 }
 0x5d2   :  { %1906 = vrcp.f32 %v1596_v4  ;;  %v1600_v60 = vsub.f32 1.0, %v1599_v3  ;;  %v1652_v55 = vand.u32 2147483647, %v1597_v0  ;;  %vm3063_vm6 = vmor %vm1618_vm4, %vm1619_vm2  ;;  %vm1648_vm7 = vweird.f32 %v1597_v0 }
 0x5d3   :  { %v1615_v49 = vsub.f32 1.0, %v1614_v56  ;;  %v1655_v14 = vor.u32 1.1754944e-38, %v1654_v45  ;;  %v1637_v27 = vand.u32 2147483647, %v1596_v4  ;;  %v1640_v32 = vor.u32 1.1754944e-38, %v1639_v29 }
 0x5d4   :  { %v1601_v59 = vmul.f32 %v1901_v58, %v1600_v60  ;;  %vm1653_vm10 = vcmp.eq.f32.partialorder %v1652_v55, 8.507059e+37  ;;  %vm1677_vm2 = vcmask 1024  }
 0x5d5   :  { %v1616_v44 = vmul.f32 %v1903_v54, %v1615_v49  ;;  %vm1638_vm1 = vcmp.eq.f32.partialorder %v1637_v27, 8.507059e+37 }
 0x5d6   :  { %v1602_v11 = vadd.f32 %v1901_v58, %v1601_v59 }
 0x5d7   :  { %v1905_v18 = vpop.eup %1904  ;;  %v1617_v47 = vadd.f32 %v1903_v54, %v1616_v44 }
 0x5d8   :  { %v1644_v5 = vmul.f32 %v1905_v18, %v1597_v0  ;;  %v1907_v52 = vpop.eup %1906  ;;  %vm1649_vm3 = vweird.f32 %v1905_v18  ;;  %v1606_v23 = vsel %vm1605_vm11, %v1901_v58, %v1602_v11 }
 0x5d9   :  { %v1629_v8 = vmul.f32 %v1907_v52, %v1596_v4  ;;  %vm1650_vm9 = vmor %vm1648_vm7, %vm1649_vm3  ;;  %v1621_v48 = vsel %vm3063_vm6, %v1903_v54, %v1617_v47  ;;  %v1611_v33 = vsel %vm1608_vm13, %v1610_v38, %v1606_v23  ;;  %vm1634_vm14 = vweird.f32 %v1907_v52 }
 0x5da   :  { %v1645_v2 = vsub.f32 1.0, %v1644_v5  ;;  %v1626_v40 = vsel %vm1623_vm12, %v1625_v26, %v1621_v48  ;;  %vm1635_vm0 = vmor %vm1633_vm15, %vm1634_vm14 }
 0x5db   :  { %v1630_v34 = vsub.f32 1.0, %v1629_v8  ;;  %v1660_v57 = vmul.f32 %v1626_v40, %v3056_v21 }
 0x5dc   :  { %v1646_v63 = vmul.f32 %v1905_v18, %v1645_v2 }
 0x5dd   :  { %v1631_v30 = vmul.f32 %v1907_v52, %v1630_v34 }
 0x5de   :  { %v1647_v10 = vadd.f32 %v1905_v18, %v1646_v63 }
 0x5df   :  { %v1632_v37 = vadd.f32 %v1907_v52, %v1631_v30 }
 0x5e0   :  { %v1651_v39 = vsel %vm1650_vm9, %v1905_v18, %v1647_v10 }
 0x5e1   :  { %v1656_v1 = vsel %vm1653_vm10, %v1655_v14, %v1651_v39  ;;  %v1636_v43 = vsel %vm1635_vm0, %v1907_v52, %v1632_v37 }
 0x5e2   :  { %v1658_v16 = vmul.f32 2.0, %v1656_v1  ;;  %v1641_v19 = vsel %vm1638_vm1, %v1640_v32, %v1636_v43 }
 0x5e4   :  { %v1759_v24 = vadd.f32 -1.0, %v1658_v16 }
 0x5e6   :  { %v1661_v22 = vmul.f32 %v1759_v24, %v1611_v33 }
 0x5e8   :  { %v1662_v13 = vadd.f32 %v1661_v22, %v1660_v57 }
 0x5ea   :  { %1908 = vtanh.f32 %v1662_v13 }
 0x5f0   :  { %v1909_v20 = vpop.eup %1908 }
 0x5f1   :  { %v1664_v46 = vmul.f32 %v1909_v20, %v1641_v19 }
 0x5f3   :  { %v1669_v21 = vmul.f32 %v1764_v28, %v1664_v46 }
 0x5f5   :  { %1670 = vadd.xlane.f32.xlu0 %v1669_v21 }
 0x668   :  { %v1671_v41 = vpop.xlane.xlu0 %1670 }
 0x669   :  { %v1676_v17 = vadd.f32 %v1765_v50, %v1671_v41 }
 0x66b   :  { %1678 = vst.msk [vmem:[%s3082_s6] sm:$0x3] %vm1677_vm2, %v1676_v17 }
 0x66c   :  { %1683 = vsyncpa [#allocation4], 1 }

</bundles_post_ra>
